<compile_context>
chip_gen: v6e
topology: v6e:2x2x1
jax: 0.10.0
libtpu: 0.0.40
codegen_flags: <defaults>
</compile_context>

<pallas_src>
import functools

import jax
import jax.numpy as jnp
import numpy as np
from jax import lax
from jax.experimental import pallas as pl
from jax.experimental.pallas import tpu as pltpu


def _round_up(n, m):
    return (n + m - 1) // m * m


def convgru_kernel(fxh_ref, w1_ref, w2_ref, out_ref, col_ref, hr_ref,
                   *, H, W, K, Ch, Cp, Chp):
    # fxh_ref: (1, Cp, LF)     padded flat [h | x | 1 | 0] buffer for this batch
    # w1_ref : (3*Ch, K*K*Cp)  fused [reset; update; out-gate-x] weights (+ bias col)
    # w2_ref : (Ch, K*K*Chp)   out-gate weights acting on h*reset
    # out_ref: (1, Ch, Nb)     padded new_state (interior cropped in the wrapper)
    # col_ref: (K*K*Cp, Nb)    im2col scratch (reused by both passes)
    # hr_ref : (Chp, LF)       padded h*reset buffer for pass 2
    P = K // 2
    Hp, Wp = H + 2 * P, W + 2 * P
    Nb = Hp * Wp
    pad0 = P * Wp + P
    f32 = jnp.float32

    # ---- Pass 1 im2col: K*K lane-dense, sublane-aligned (Cp, Nb) copies. ----
    for t in range(K * K):
        dy, dx = divmod(t, K)
        col_ref[pl.ds(t * Cp, Cp), :] = fxh_ref[0, :, pl.ds(dy * Wp + dx, Nb)]

    # Fused [reset; update; out-gate(x-part)] pre-activations in ONE matmul;
    # biases ride in the constant-1 channel column (center tap only).
    acc1 = jnp.dot(w1_ref[...], col_ref[...], preferred_element_type=f32)
    reset = jax.nn.sigmoid(acc1[0:Ch])
    update = jax.nn.sigmoid(acc1[Ch:2 * Ch])
    out_x = acc1[2 * Ch:3 * Ch]

    # h at output-aligned padded positions (exactly zero on the halo border).
    h_pad = fxh_ref[0, pl.ds(0, Ch), pl.ds(pad0, Nb)].astype(f32)

    # Padded h*reset buffer: zero guards / spare rows, then one lane-dense slab
    # store.  Border positions of h_pad are zero, so SAME padding stays exact.
    hr_ref[...] = jnp.zeros_like(hr_ref)
    hr_ref[pl.ds(0, Ch), pl.ds(pad0, Nb)] = (h_pad * reset).astype(hr_ref.dtype)

    # ---- Pass 2 im2col over h*reset, then ONE matmul for the out-gate h-part. ----
    for t in range(K * K):
        dy, dx = divmod(t, K)
        col_ref[pl.ds(t * Chp, Chp), :] = hr_ref[:, pl.ds(dy * Wp + dx, Nb)]
    acc2 = out_x + jnp.dot(w2_ref[...], col_ref[pl.ds(0, K * K * Chp), :],
                           preferred_element_type=f32)
    out_t = jnp.tanh(acc2)

    # Single lane-dense store of the padded new_state slab.
    out_ref[0, :, :] = h_pad * (1.0 - update) + out_t * update


def pack_convgru_params(params, input_size, *, mxu_dtype=jnp.bfloat16):
    """One-time repack of the three OIHW conv weights into the kernel's fused,
    tap-major layout.  Call this ONCE (outside any scan over timesteps)."""
    wr, br, wu, bu, wo, bo = params
    Ch, C, K, _ = wr.shape
    Cin = input_size
    assert C == Cin + Ch
    assert K % 2 == 1, "kernel assumes odd kernel_size (symmetric SAME padding)"
    P = K // 2
    Cp = _round_up(C + 1, 16)   # [h | x | bias-ones | zero pad] channel rows
    Chp = _round_up(Ch, 16)
    f32 = jnp.float32

    def gate_block(w, b, use_h):
        # PyTorch conv input-channel order is [x | h]; kernel order is [h | x | 1 | 0].
        w = w.astype(f32)
        wh = w[:, Cin:] if use_h else jnp.zeros((Ch, Ch, K, K), f32)
        wx = w[:, :Cin]
        wb = jnp.zeros((Ch, 1, K, K), f32).at[:, 0, P, P].set(b.astype(f32))
        wz = jnp.zeros((Ch, Cp - C - 1, K, K), f32)
        return jnp.concatenate([wh, wx, wb, wz], axis=1)         # (Ch, Cp, K, K)

    # Out-gate h-columns are zeroed in pass 1 (that part acts on h*reset in pass 2).
    w1 = jnp.concatenate([gate_block(wr, br, True),
                          gate_block(wu, bu, True),
                          gate_block(wo, bo, False)], axis=0)    # (3Ch, Cp, K, K)
    w1 = jnp.transpose(w1, (0, 2, 3, 1)).reshape(3 * Ch, K * K * Cp)

    w2 = jnp.concatenate([wo.astype(f32)[:, Cin:],
                          jnp.zeros((Ch, Chp - Ch, K, K), f32)], axis=1)
    w2 = jnp.transpose(w2, (0, 2, 3, 1)).reshape(Ch, K * K * Chp)

    return dict(w1=w1.astype(mxu_dtype), w2=w2.astype(mxu_dtype),
                input_size=Cin, hidden_size=Ch, kernel_size=K,
                Cp=Cp, Chp=Chp, mxu_dtype=mxu_dtype)


def convgru_cell(x_nchw, prev_state_nchw, packed):
    """ConvGRUCell.forward.  x: (B, Cin, H, W) NCHW; returns new_state (B, Ch, H, W)."""
    Cin, Ch, K = packed["input_size"], packed["hidden_size"], packed["kernel_size"]
    Cp, Chp, mxu_dtype = packed["Cp"], packed["Chp"], packed["mxu_dtype"]
    B, Cin_, H, W = x_nchw.shape
    assert Cin_ == Cin
    P = K // 2
    Hp, Wp = H + 2 * P, W + 2 * P
    Nb = Hp * Wp
    pad0 = P * Wp + P
    LF = Nb + 2 * pad0
    f32 = jnp.float32

    if prev_state_nchw is None:
        prev_state_nchw = jnp.zeros((B, Ch, H, W), f32)

    # Cheap fused XLA concat/pad in HBM: channel-major [h | x | 1 | 0] buffer,
    # spatially zero-padded, flattened, with a pad0 guard at both ends so every
    # lane-shifted tap slice in the kernel stays in bounds (zeros there).
    parts = [prev_state_nchw.astype(mxu_dtype), x_nchw.astype(mxu_dtype),
             jnp.ones((B, 1, H, W), mxu_dtype),
             jnp.zeros((B, Cp - (Cin + Ch) - 1, H, W), mxu_dtype)]
    fxh = jnp.concatenate(parts, axis=1)                         # (B, Cp, H, W)
    fxh = jnp.pad(fxh, ((0, 0), (0, 0), (P, P), (P, P)))         # (B, Cp, Hp, Wp)
    fxh = jnp.pad(fxh.reshape(B, Cp, Nb), ((0, 0), (0, 0), (pad0, pad0)))

    kernel = functools.partial(convgru_kernel, H=H, W=W, K=K,
                               Ch=Ch, Cp=Cp, Chp=Chp)
    out_padded = pl.pallas_call(
        kernel,
        out_shape=jax.ShapeDtypeStruct((B, Ch, Nb), f32),
        grid_spec=pltpu.PrefetchScalarGridSpec(
            num_scalar_prefetch=0,
            grid=(B,),                       # one batch per step -> megacore-parallel
            in_specs=[
                pl.BlockSpec((1, Cp, LF), lambda b: (b, 0, 0)),
                pl.BlockSpec((3 * Ch, K * K * Cp), lambda b: (0, 0)),
                pl.BlockSpec((Ch, K * K * Chp), lambda b: (0, 0)),
            ],
            out_specs=pl.BlockSpec((1, Ch, Nb), lambda b: (b, 0, 0)),
            scratch_shapes=[
                pltpu.VMEM((K * K * Cp, Nb), mxu_dtype),   # im2col (both passes)
                pltpu.VMEM((Chp, LF), mxu_dtype),          # padded h*reset buffer
            ],
        ),
        compiler_params=pltpu.CompilerParams(
            dimension_semantics=("parallel",)),
        # TODO(synk): for a scan over time, keep the state in the padded layout
        # across steps and alias it into fxh's h rows (input_output_aliases) to
        # drop one HBM copy per step.
        # TODO(synk): for large H*W / Ch on v7x (64 MiB VMEM), add a lane-dense
        # spatial grid axis over Nb (multiple of 512) with a VMEM accumulator and
        # set vmem_limit_bytes explicitly.
    )(fxh, packed["w1"], packed["w2"])

    # Crop the valid interior with a cheap fused XLA slice.
    out = out_padded.reshape(B, Ch, Hp, Wp)[:, :, P:P + H, P:P + W]
    return out


def orthogonal_conv_weight(key, out_c, in_c, k):
    """Mimic torch.nn.init.orthogonal_ on a Conv2d weight, returned as OIHW."""
    fan_in = in_c * k * k
    a = jax.random.normal(key, (fan_in, out_c), jnp.float32)
    q, r = jnp.linalg.qr(a)
    q = q * jnp.sign(jnp.diagonal(r))[None, :]
    return q.T.reshape(out_c, in_c, k, k)


def _ref_convgru(x, h, params):
    """Pure-JAX reference matching the PyTorch forward (NCHW / OIHW)."""
    wr, br, wu, bu, wo, bo = params
    dn = ('NCHW', 'OIHW', 'NCHW')

    def conv(inp, w, b):
        y = lax.conv_general_dilated(inp, w, (1, 1), 'SAME', dimension_numbers=dn,
                                     precision=lax.Precision.HIGHEST)
        return y + b.reshape(1, -1, 1, 1)

    xh = jnp.concatenate([x, h], axis=1)
    reset = jax.nn.sigmoid(conv(xh, wr, br))
    update = jax.nn.sigmoid(conv(xh, wu, bu))
    out_in = jnp.tanh(conv(jnp.concatenate([x, h * reset], axis=1), wo, bo))
    return h * (1.0 - update) + out_in * update


if __name__ == "__main__":
    B, Cin, Ch, H, W, K = 2, 4, 8, 16, 16, 3

    key = jax.random.PRNGKey(0)
    kx, kh, k1, k2, k3, kb = jax.random.split(key, 6)

    x = jax.random.normal(kx, (B, Cin, H, W), jnp.float32)
    h0 = jax.random.normal(kh, (B, Ch, H, W), jnp.float32)

    # Orthogonal conv weights as in ConvGRUCell.__init__; small nonzero biases so
    # the fused in-matmul bias path is actually exercised.
    wr = orthogonal_conv_weight(k1, Ch, Cin + Ch, K)
    wu = orthogonal_conv_weight(k2, Ch, Cin + Ch, K)
    wo = orthogonal_conv_weight(k3, Ch, Cin + Ch, K)
    br, bu, bo = 0.1 * jax.random.normal(kb, (3, Ch), jnp.float32)
    params = (wr, br, wu, bu, wo, bo)

    ref = jax.block_until_ready(_ref_convgru(x, h0, params))

    # Exact-parity path (f32 MXU operands).
    packed_f32 = pack_convgru_params(params, Cin, mxu_dtype=jnp.float32)
    out_f32 = jax.block_until_ready(convgru_cell(x, h0, packed_f32))
    assert out_f32.shape == (B, Ch, H, W)
    assert np.allclose(np.asarray(out_f32), np.asarray(ref), atol=1e-3, rtol=1e-3)

    # prev_state=None path (zero initial state).
    ref0 = jax.block_until_ready(
        _ref_convgru(x, jnp.zeros((B, Ch, H, W), jnp.float32), params))
    out0 = jax.block_until_ready(convgru_cell(x, None, packed_f32))
    assert np.allclose(np.asarray(out0), np.asarray(ref0), atol=1e-3, rtol=1e-3)

    # Default fast path (bf16 MXU operands, f32 accumulation & f32 gating math).
    packed_bf16 = pack_convgru_params(params, Cin)   # mxu_dtype=bfloat16
    out_bf16 = jax.block_until_ready(convgru_cell(x, h0, packed_bf16))
    err = np.abs(np.asarray(out_bf16) - np.asarray(ref))
    rel = np.linalg.norm(err) / np.linalg.norm(np.asarray(ref))
    # Looser bound: conv inputs/weights are bf16-rounded (accumulation stays f32).
    assert rel < 3e-2 and err.max() < 1.5e-1

    print("KERNEL_OK")
</pallas_src>

<mosaic_0001>
module attributes {stable_mosaic.version = 11 : i64} {
  func.func @convgru_kernel(%arg0: i32, %arg1: memref<1x16x362xf32, #tpu.memory_space<vmem>>, %arg2: memref<24x144xf32, #tpu.memory_space<vmem>>, %arg3: memref<8x144xf32, #tpu.memory_space<vmem>>, %arg4: memref<1x8x324xf32, #tpu.memory_space<vmem>>, %arg5: memref<144x324xf32, #tpu.memory_space<vmem>>, %arg6: memref<16x362xf32, #tpu.memory_space<vmem>>) attributes {dimension_semantics = [#tpu.dimension_semantics<parallel>], iteration_bounds = array<i64: 2>, scalar_prefetch = 0 : i64, scratch_operands = 2 : i64, tpu.core_type = #tpu.core_type<tc>, window_params = [{transform_indices = @transform_0, window_bounds = array<i64: 1, 16, 362>}, {pipeline_mode = #tpu.pipeline_mode<synchronous>, transform_indices = @transform_1, window_bounds = array<i64: 24, 144>}, {pipeline_mode = #tpu.pipeline_mode<synchronous>, transform_indices = @transform_2, window_bounds = array<i64: 8, 144>}, {transform_indices = @transform_3, window_bounds = array<i64: 1, 8, 324>}]} {
    %c0 = arith.constant 0 : index
    %c0_0 = arith.constant 0 : index
    %c0_1 = arith.constant 0 : index
    %0 = vector.load %arg1[%c0, %c0_0, %c0_1] : memref<1x16x362xf32, #tpu.memory_space<vmem>>, vector<1x16x324xf32>
    %1 = vector.shape_cast %0 : vector<1x16x324xf32> to vector<16x324xf32>
    %c0_2 = arith.constant 0 : index
    %c0_3 = arith.constant 0 : index
    %2 = vector.load %arg5[%c0_2, %c0_3] : memref<144x324xf32, #tpu.memory_space<vmem>>, vector<16x324xf32>
    tpu.vector_store %arg5[%c0_2, %c0_3], %1 {strides = array<i32>} : memref<144x324xf32, #tpu.memory_space<vmem>>, vector<16x324xf32>,
    %c0_4 = arith.constant 0 : index
    %c0_5 = arith.constant 0 : index
    %c1 = arith.constant 1 : index
    %3 = vector.load %arg1[%c0_4, %c0_5, %c1] : memref<1x16x362xf32, #tpu.memory_space<vmem>>, vector<1x16x324xf32>
    %4 = vector.shape_cast %3 : vector<1x16x324xf32> to vector<16x324xf32>
    %c16 = arith.constant 16 : index
    %c0_6 = arith.constant 0 : index
    %5 = vector.load %arg5[%c16, %c0_6] : memref<144x324xf32, #tpu.memory_space<vmem>>, vector<16x324xf32>
    tpu.vector_store %arg5[%c16, %c0_6], %4 {strides = array<i32>} : memref<144x324xf32, #tpu.memory_space<vmem>>, vector<16x324xf32>,
    %c0_7 = arith.constant 0 : index
    %c0_8 = arith.constant 0 : index
    %c2 = arith.constant 2 : index
    %6 = vector.load %arg1[%c0_7, %c0_8, %c2] : memref<1x16x362xf32, #tpu.memory_space<vmem>>, vector<1x16x324xf32>
    %7 = vector.shape_cast %6 : vector<1x16x324xf32> to vector<16x324xf32>
    %c32 = arith.constant 32 : index
    %c0_9 = arith.constant 0 : index
    %8 = vector.load %arg5[%c32, %c0_9] : memref<144x324xf32, #tpu.memory_space<vmem>>, vector<16x324xf32>
    tpu.vector_store %arg5[%c32, %c0_9], %7 {strides = array<i32>} : memref<144x324xf32, #tpu.memory_space<vmem>>, vector<16x324xf32>,
    %c0_10 = arith.constant 0 : index
    %c0_11 = arith.constant 0 : index
    %c18 = arith.constant 18 : index
    %9 = vector.load %arg1[%c0_10, %c0_11, %c18] : memref<1x16x362xf32, #tpu.memory_space<vmem>>, vector<1x16x324xf32>
    %10 = vector.shape_cast %9 : vector<1x16x324xf32> to vector<16x324xf32>
    %c48 = arith.constant 48 : index
    %c0_12 = arith.constant 0 : index
    %11 = vector.load %arg5[%c48, %c0_12] : memref<144x324xf32, #tpu.memory_space<vmem>>, vector<16x324xf32>
    tpu.vector_store %arg5[%c48, %c0_12], %10 {strides = array<i32>} : memref<144x324xf32, #tpu.memory_space<vmem>>, vector<16x324xf32>,
    %c0_13 = arith.constant 0 : index
    %c0_14 = arith.constant 0 : index
    %c19 = arith.constant 19 : index
    %12 = vector.load %arg1[%c0_13, %c0_14, %c19] : memref<1x16x362xf32, #tpu.memory_space<vmem>>, vector<1x16x324xf32>
    %13 = vector.shape_cast %12 : vector<1x16x324xf32> to vector<16x324xf32>
    %c64 = arith.constant 64 : index
    %c0_15 = arith.constant 0 : index
    %14 = vector.load %arg5[%c64, %c0_15] : memref<144x324xf32, #tpu.memory_space<vmem>>, vector<16x324xf32>
    tpu.vector_store %arg5[%c64, %c0_15], %13 {strides = array<i32>} : memref<144x324xf32, #tpu.memory_space<vmem>>, vector<16x324xf32>,
    %c0_16 = arith.constant 0 : index
    %c0_17 = arith.constant 0 : index
    %c20 = arith.constant 20 : index
    %15 = vector.load %arg1[%c0_16, %c0_17, %c20] : memref<1x16x362xf32, #tpu.memory_space<vmem>>, vector<1x16x324xf32>
    %16 = vector.shape_cast %15 : vector<1x16x324xf32> to vector<16x324xf32>
    %c80 = arith.constant 80 : index
    %c0_18 = arith.constant 0 : index
    %17 = vector.load %arg5[%c80, %c0_18] : memref<144x324xf32, #tpu.memory_space<vmem>>, vector<16x324xf32>
    tpu.vector_store %arg5[%c80, %c0_18], %16 {strides = array<i32>} : memref<144x324xf32, #tpu.memory_space<vmem>>, vector<16x324xf32>,
    %c0_19 = arith.constant 0 : index
    %c0_20 = arith.constant 0 : index
    %c36 = arith.constant 36 : index
    %18 = vector.load %arg1[%c0_19, %c0_20, %c36] : memref<1x16x362xf32, #tpu.memory_space<vmem>>, vector<1x16x324xf32>
    %19 = vector.shape_cast %18 : vector<1x16x324xf32> to vector<16x324xf32>
    %c96 = arith.constant 96 : index
    %c0_21 = arith.constant 0 : index
    %20 = vector.load %arg5[%c96, %c0_21] : memref<144x324xf32, #tpu.memory_space<vmem>>, vector<16x324xf32>
    tpu.vector_store %arg5[%c96, %c0_21], %19 {strides = array<i32>} : memref<144x324xf32, #tpu.memory_space<vmem>>, vector<16x324xf32>,
    %c0_22 = arith.constant 0 : index
    %c0_23 = arith.constant 0 : index
    %c37 = arith.constant 37 : index
    %21 = vector.load %arg1[%c0_22, %c0_23, %c37] : memref<1x16x362xf32, #tpu.memory_space<vmem>>, vector<1x16x324xf32>
    %22 = vector.shape_cast %21 : vector<1x16x324xf32> to vector<16x324xf32>
    %c112 = arith.constant 112 : index
    %c0_24 = arith.constant 0 : index
    %23 = vector.load %arg5[%c112, %c0_24] : memref<144x324xf32, #tpu.memory_space<vmem>>, vector<16x324xf32>
    tpu.vector_store %arg5[%c112, %c0_24], %22 {strides = array<i32>} : memref<144x324xf32, #tpu.memory_space<vmem>>, vector<16x324xf32>,
    %c0_25 = arith.constant 0 : index
    %c0_26 = arith.constant 0 : index
    %c38 = arith.constant 38 : index
    %24 = vector.load %arg1[%c0_25, %c0_26, %c38] : memref<1x16x362xf32, #tpu.memory_space<vmem>>, vector<1x16x324xf32>
    %25 = vector.shape_cast %24 : vector<1x16x324xf32> to vector<16x324xf32>
    %c128 = arith.constant 128 : index
    %c0_27 = arith.constant 0 : index
    %26 = vector.load %arg5[%c128, %c0_27] : memref<144x324xf32, #tpu.memory_space<vmem>>, vector<16x324xf32>
    tpu.vector_store %arg5[%c128, %c0_27], %25 {strides = array<i32>} : memref<144x324xf32, #tpu.memory_space<vmem>>, vector<16x324xf32>,
    %c0_28 = arith.constant 0 : index
    %c0_29 = arith.constant 0 : index
    %27 = vector.load %arg2[%c0_28, %c0_29] : memref<24x144xf32, #tpu.memory_space<vmem>>, vector<24x144xf32>
    %c0_30 = arith.constant 0 : index
    %c0_31 = arith.constant 0 : index
    %28 = vector.load %arg5[%c0_30, %c0_31] : memref<144x324xf32, #tpu.memory_space<vmem>>, vector<144x324xf32>
    %cst = arith.constant dense<0.000000e+00> : vector<24x324xf32>
    %29 = tpu.matmul %27, %28, %cst {dimension_numbers = #tpu.dot_dimension_numbers<[1], [0], [0], [1], [0, 0, 1, 1], [], []>} : vector<24x144xf32>, vector<144x324xf32>, vector<24x324xf32> -> vector<24x324xf32>
    %30 = vector.extract_strided_slice %29 {offsets = [0, 0], sizes = [8, 324], strides = [1, 1]} : vector<24x324xf32> to vector<8x324xf32>
    %31 = arith.negf %30 : vector<8x324xf32>
    %32 = math.exp %31 : vector<8x324xf32>
    %cst_32 = arith.constant 1.000000e+00 : f32
    %33 = vector.broadcast %cst_32 : f32 to vector<8x324xf32>
    %34 = arith.addf %33, %32 : vector<8x324xf32>
    %35 = arith.divf %33, %34 : vector<8x324xf32>
    %36 = vector.extract_strided_slice %29 {offsets = [8, 0], sizes = [8, 324], strides = [1, 1]} : vector<24x324xf32> to vector<8x324xf32>
    %37 = arith.negf %36 : vector<8x324xf32>
    %38 = math.exp %37 : vector<8x324xf32>
    %cst_33 = arith.constant 1.000000e+00 : f32
    %39 = vector.broadcast %cst_33 : f32 to vector<8x324xf32>
    %40 = arith.addf %39, %38 : vector<8x324xf32>
    %41 = arith.divf %39, %40 : vector<8x324xf32>
    %42 = vector.extract_strided_slice %29 {offsets = [16, 0], sizes = [8, 324], strides = [1, 1]} : vector<24x324xf32> to vector<8x324xf32>
    %c0_34 = arith.constant 0 : index
    %c0_35 = arith.constant 0 : index
    %c19_36 = arith.constant 19 : index
    %43 = vector.load %arg1[%c0_34, %c0_35, %c19_36] : memref<1x16x362xf32, #tpu.memory_space<vmem>>, vector<1x8x324xf32>
    %44 = vector.shape_cast %43 : vector<1x8x324xf32> to vector<8x324xf32>
    %cst_37 = arith.constant 0.000000e+00 : f32
    %45 = vector.broadcast %cst_37 : f32 to vector<16x362xf32>
    %c0_38 = arith.constant 0 : index
    %c0_39 = arith.constant 0 : index
    %46 = vector.load %arg6[%c0_38, %c0_39] : memref<16x362xf32, #tpu.memory_space<vmem>>, vector<16x362xf32>
    tpu.vector_store %arg6[%c0_38, %c0_39], %45 {strides = array<i32>} : memref<16x362xf32, #tpu.memory_space<vmem>>, vector<16x362xf32>,
    %47 = arith.mulf %44, %35 : vector<8x324xf32>
    %c0_40 = arith.constant 0 : index
    %c19_41 = arith.constant 19 : index
    %48 = vector.load %arg6[%c0_40, %c19_41] : memref<16x362xf32, #tpu.memory_space<vmem>>, vector<8x324xf32>
    tpu.vector_store %arg6[%c0_40, %c19_41], %47 {strides = array<i32>} : memref<16x362xf32, #tpu.memory_space<vmem>>, vector<8x324xf32>,
    %c0_42 = arith.constant 0 : index
    %c0_43 = arith.constant 0 : index
    %49 = vector.load %arg6[%c0_42, %c0_43] : memref<16x362xf32, #tpu.memory_space<vmem>>, vector<16x324xf32>
    %c0_44 = arith.constant 0 : index
    %c0_45 = arith.constant 0 : index
    %50 = vector.load %arg5[%c0_44, %c0_45] : memref<144x324xf32, #tpu.memory_space<vmem>>, vector<16x324xf32>
    tpu.vector_store %arg5[%c0_44, %c0_45], %49 {strides = array<i32>} : memref<144x324xf32, #tpu.memory_space<vmem>>, vector<16x324xf32>,
    %c0_46 = arith.constant 0 : index
    %c1_47 = arith.constant 1 : index
    %51 = vector.load %arg6[%c0_46, %c1_47] : memref<16x362xf32, #tpu.memory_space<vmem>>, vector<16x324xf32>
    %c16_48 = arith.constant 16 : index
    %c0_49 = arith.constant 0 : index
    %52 = vector.load %arg5[%c16_48, %c0_49] : memref<144x324xf32, #tpu.memory_space<vmem>>, vector<16x324xf32>
    tpu.vector_store %arg5[%c16_48, %c0_49], %51 {strides = array<i32>} : memref<144x324xf32, #tpu.memory_space<vmem>>, vector<16x324xf32>,
    %c0_50 = arith.constant 0 : index
    %c2_51 = arith.constant 2 : index
    %53 = vector.load %arg6[%c0_50, %c2_51] : memref<16x362xf32, #tpu.memory_space<vmem>>, vector<16x324xf32>
    %c32_52 = arith.constant 32 : index
    %c0_53 = arith.constant 0 : index
    %54 = vector.load %arg5[%c32_52, %c0_53] : memref<144x324xf32, #tpu.memory_space<vmem>>, vector<16x324xf32>
    tpu.vector_store %arg5[%c32_52, %c0_53], %53 {strides = array<i32>} : memref<144x324xf32, #tpu.memory_space<vmem>>, vector<16x324xf32>,
    %c0_54 = arith.constant 0 : index
    %c18_55 = arith.constant 18 : index
    %55 = vector.load %arg6[%c0_54, %c18_55] : memref<16x362xf32, #tpu.memory_space<vmem>>, vector<16x324xf32>
    %c48_56 = arith.constant 48 : index
    %c0_57 = arith.constant 0 : index
    %56 = vector.load %arg5[%c48_56, %c0_57] : memref<144x324xf32, #tpu.memory_space<vmem>>, vector<16x324xf32>
    tpu.vector_store %arg5[%c48_56, %c0_57], %55 {strides = array<i32>} : memref<144x324xf32, #tpu.memory_space<vmem>>, vector<16x324xf32>,
    %c0_58 = arith.constant 0 : index
    %c19_59 = arith.constant 19 : index
    %57 = vector.load %arg6[%c0_58, %c19_59] : memref<16x362xf32, #tpu.memory_space<vmem>>, vector<16x324xf32>
    %c64_60 = arith.constant 64 : index
    %c0_61 = arith.constant 0 : index
    %58 = vector.load %arg5[%c64_60, %c0_61] : memref<144x324xf32, #tpu.memory_space<vmem>>, vector<16x324xf32>
    tpu.vector_store %arg5[%c64_60, %c0_61], %57 {strides = array<i32>} : memref<144x324xf32, #tpu.memory_space<vmem>>, vector<16x324xf32>,
    %c0_62 = arith.constant 0 : index
    %c20_63 = arith.constant 20 : index
    %59 = vector.load %arg6[%c0_62, %c20_63] : memref<16x362xf32, #tpu.memory_space<vmem>>, vector<16x324xf32>
    %c80_64 = arith.constant 80 : index
    %c0_65 = arith.constant 0 : index
    %60 = vector.load %arg5[%c80_64, %c0_65] : memref<144x324xf32, #tpu.memory_space<vmem>>, vector<16x324xf32>
    tpu.vector_store %arg5[%c80_64, %c0_65], %59 {strides = array<i32>} : memref<144x324xf32, #tpu.memory_space<vmem>>, vector<16x324xf32>,
    %c0_66 = arith.constant 0 : index
    %c36_67 = arith.constant 36 : index
    %61 = vector.load %arg6[%c0_66, %c36_67] : memref<16x362xf32, #tpu.memory_space<vmem>>, vector<16x324xf32>
    %c96_68 = arith.constant 96 : index
    %c0_69 = arith.constant 0 : index
    %62 = vector.load %arg5[%c96_68, %c0_69] : memref<144x324xf32, #tpu.memory_space<vmem>>, vector<16x324xf32>
    tpu.vector_store %arg5[%c96_68, %c0_69], %61 {strides = array<i32>} : memref<144x324xf32, #tpu.memory_space<vmem>>, vector<16x324xf32>,
    %c0_70 = arith.constant 0 : index
    %c37_71 = arith.constant 37 : index
    %63 = vector.load %arg6[%c0_70, %c37_71] : memref<16x362xf32, #tpu.memory_space<vmem>>, vector<16x324xf32>
    %c112_72 = arith.constant 112 : index
    %c0_73 = arith.constant 0 : index
    %64 = vector.load %arg5[%c112_72, %c0_73] : memref<144x324xf32, #tpu.memory_space<vmem>>, vector<16x324xf32>
    tpu.vector_store %arg5[%c112_72, %c0_73], %63 {strides = array<i32>} : memref<144x324xf32, #tpu.memory_space<vmem>>, vector<16x324xf32>,
    %c0_74 = arith.constant 0 : index
    %c38_75 = arith.constant 38 : index
    %65 = vector.load %arg6[%c0_74, %c38_75] : memref<16x362xf32, #tpu.memory_space<vmem>>, vector<16x324xf32>
    %c128_76 = arith.constant 128 : index
    %c0_77 = arith.constant 0 : index
    %66 = vector.load %arg5[%c128_76, %c0_77] : memref<144x324xf32, #tpu.memory_space<vmem>>, vector<16x324xf32>
    tpu.vector_store %arg5[%c128_76, %c0_77], %65 {strides = array<i32>} : memref<144x324xf32, #tpu.memory_space<vmem>>, vector<16x324xf32>,
    %c0_78 = arith.constant 0 : index
    %c0_79 = arith.constant 0 : index
    %67 = vector.load %arg3[%c0_78, %c0_79] : memref<8x144xf32, #tpu.memory_space<vmem>>, vector<8x144xf32>
    %c0_80 = arith.constant 0 : index
    %c0_81 = arith.constant 0 : index
    %68 = vector.load %arg5[%c0_80, %c0_81] : memref<144x324xf32, #tpu.memory_space<vmem>>, vector<144x324xf32>
    %cst_82 = arith.constant dense<0.000000e+00> : vector<8x324xf32>
    %69 = tpu.matmul %67, %68, %cst_82 {dimension_numbers = #tpu.dot_dimension_numbers<[1], [0], [0], [1], [0, 0, 1, 1], [], []>} : vector<8x144xf32>, vector<144x324xf32>, vector<8x324xf32> -> vector<8x324xf32>
    %70 = arith.addf %42, %69 : vector<8x324xf32>
    %71 = math.tanh %70 : vector<8x324xf32>
    %cst_83 = arith.constant 1.000000e+00 : f32
    %72 = vector.broadcast %cst_83 : f32 to vector<8x324xf32>
    %73 = arith.subf %72, %41 : vector<8x324xf32>
    %74 = arith.mulf %44, %73 : vector<8x324xf32>
    %75 = arith.mulf %71, %41 : vector<8x324xf32>
    %76 = arith.addf %74, %75 : vector<8x324xf32>
    %c0_84 = arith.constant 0 : index
    %c0_85 = arith.constant 0 : index
    %c0_86 = arith.constant 0 : index
    %77 = vector.load %arg4[%c0_84, %c0_85, %c0_86] : memref<1x8x324xf32, #tpu.memory_space<vmem>>, vector<1x8x324xf32>
    %78 = vector.shape_cast %77 : vector<1x8x324xf32> to vector<8x324xf32>
    %79 = vector.shape_cast %76 : vector<8x324xf32> to vector<1x8x324xf32>
    tpu.vector_store %arg4[%c0_84, %c0_85, %c0_86], %79 {strides = array<i32>} : memref<1x8x324xf32, #tpu.memory_space<vmem>>, vector<1x8x324xf32>,
    return
  }
  func.func @transform_0(%arg0: i32) -> (i32, i32, i32) {
    %c0_i32 = arith.constant 0 : i32
    %c0_i32_0 = arith.constant 0 : i32
    %c0_i32_1 = arith.constant 0 : i32
    return %arg0, %c0_i32, %c0_i32_0 : i32, i32, i32
  }
  func.func @transform_1(%arg0: i32) -> (i32, i32) {
    %c0_i32 = arith.constant 0 : i32
    %c0_i32_0 = arith.constant 0 : i32
    %c0_i32_1 = arith.constant 0 : i32
    return %c0_i32, %c0_i32_0 : i32, i32
  }
  func.func @transform_2(%arg0: i32) -> (i32, i32) {
    %c0_i32 = arith.constant 0 : i32
    %c0_i32_0 = arith.constant 0 : i32
    %c0_i32_1 = arith.constant 0 : i32
    return %c0_i32, %c0_i32_0 : i32, i32
  }
  func.func @transform_3(%arg0: i32) -> (i32, i32, i32) {
    %c0_i32 = arith.constant 0 : i32
    %c0_i32_0 = arith.constant 0 : i32
    %c0_i32_1 = arith.constant 0 : i32
    return %arg0, %c0_i32, %c0_i32_0 : i32, i32, i32
  }
}

</mosaic_0001>

<bundles_post_ra>
// kernel: tpu_custom_call.1
= control target key start
LH: loop header
LB: loop body
LE: loop exit
PB: predicated region body
PF: predicated region fallthrough
CT: control target
= control target key end

     0   :  { %8 = vsyncpa [#allocation5], 0  ;;  %s2557_s0 = inlined_call_operand.hbm [shape: f32[2,16,362], index: 0, kind: input, shape index: {}]   ;;  %s2558_s1 = inlined_call_operand.hbm [shape: f32[24,144], index: 1, kind: input, shape index: {}]   ;;  %s2559_s2 = inlined_call_operand.hbm [shape: f32[8,144], index: 2, kind: input, shape index: {}]   ;;  %s2560_s3 = inlined_call_operand.hbm [shape: f32[2,8,324], index: 3, kind: output, shape index: {}]  }
   0x1   :  { %10 = vsyncpa [#allocation5 + $0x1], 0 }
   0x2   :  { %11 = vsyncpa [#allocation8], 0 }
   0x3   :  { %12 = vsyncpa [#allocation6], 0 }
   0x4   :  { %14 = vsyncpa [#allocation6 + $0x1], 0  ;;  %s1891_s12 = smov 0   ;;  %s1893_s13 = smov 0  }
   0x5   :  { %s1895_s14 = smov 0   ;;  %s1897_s15 = smov 0  }
   0x6 LB: > { %s1912_s16 = sadd.s32 4294967295, %s1851_s15   ;;  %s1558_s17 = sadd.s32 4294967294, %s1851_s15   ;;  %s1851_s15 = sphi %s1897_s15, %s2582_s15   ;;  %s1847_s14 = sphi %s1895_s14, %s2581_s14   ;;  %s1843_s13 = sphi %s1893_s13, %s2580_s13   ;;  %s1839_s12 = sphi %s1891_s12, %s2579_s12  }
   0x7   : > { %p40_p0 = scmp.ne.s32.totalorder %s1843_s13, %s1839_s12  ;;  %p2561_p1 = scmp.eq.s32.totalorder %s1912_s16, 0 }
   0x8   : > { %p112_p3 = scmp.eq.s32.totalorder %s1558_s17, 1  ;;  %p1559_p5 = scmp.ge.s32.totalorder %s1851_s15, 1 }
   0x9   : > { %p1921_p4 = por %p2561_p1, %p40_p0  ;;  %p119_p7 = scmp.lt.s32.totalorder %s1851_s15, 3 }
   0xa   : > { %p1926_p6 = por %p112_p3, %p40_p0  ;;  %s1853_s21 = smov [#allocation7]  }
   0xb   : > { %s2565_s18 = scalar_select %p1921_p4, 1, 0 }
   0xc   : > { %s2566_s19 = scalar_select %p1926_p6, 1, 0 }
   0xd   : > { %p1931_p8 = pnand %p1559_p5, %p119_p7  ;;  %s131_s22 = sshll.u32 %s1853_s21, 4  ;;  %s132_s22 = int_to_ptr.vmem [resolvable:$true] %s131_s22 }
   0xe   : > { %s1854_s24 = smov [#allocation9]   ;;  %s1714_s26 = scalar_lea.vmem %s132_s22, 768 }
   0xf   : > { %s2567_s20 = scalar_select %p1931_p8, 1, 0 }
  0x10   : > { %p1601_p9 = pneg %p1931_p8  ;;  %s145_s25 = sshll.u32 %s1854_s24, 4  ;;  %s146_s25 = int_to_ptr.vmem [resolvable:$true] %s145_s25 }
  0x11   : > { %p1715_p13 = scmp.ne.s32.totalorder %s132_s22, %s1714_s26  ;;  %p1722_p5 = scmp.lt.s32.totalorder %s132_s22, %s132_s22 }
  0x12   : > { %p1940_p11 = pnand %p1601_p9, %p2561_p1  ;;  %p1723_p7 = scmp.lt.s32.totalorder %s1714_s26, %s1714_s26 }
  0x14   : > { %p1705_p12 = pneg %p1940_p11  ;;  %p1724_p10 = por %p1723_p7, %p1722_p5 }
  0x16   : > { %p1717_p0 = pnand %p1715_p13, %p1705_p12 }
  0x18   : > { %p1718_p3 = pneg %p1717_p0 }
  0x1a   : > { %p1725_p9 = pnand %p1724_p10, %p1718_p3 }
  0x1c   : > { %1728 = shalt.err (!%p1725_p9)
}
  0x1d   : > { %s1855_s27 = smov 256   ;;  %s1856_s28 = smov 16  }
  0x1e   : > { %1604 = dma.hbm_to_vmem [thread:$0]  (!%p1940_p11), %s2558_s1, 768, %s132_s22, [#allocation8], %s1855_s27, %s1855_s27, %s1856_s28  }
  0x1f   : > { %s1740_s4 = scalar_lea.vmem %s146_s25, 256  ;;  %p1748_p2 = scmp.lt.s32.totalorder %s146_s25, %s146_s25 }
  0x20   : > { %p1741_p1 = scmp.ne.s32.totalorder %s146_s25, %s1740_s4  ;;  %p1749_p6 = scmp.lt.s32.totalorder %s1740_s4, %s1740_s4 }
  0x22   : > { %p1743_p13 = pnand %p1741_p1, %p1705_p12  ;;  %p1750_p5 = por %p1749_p6, %p1748_p2 }
  0x24   : > { %p1744_p0 = pneg %p1743_p13 }
  0x26   : > { %p1751_p10 = pnand %p1750_p5, %p1744_p0 }
  0x28   : > { %1754 = shalt.err (!%p1751_p10)
}
  0x29   : > { %1607 = dma.hbm_to_vmem [thread:$0]  (!%p1940_p11), %s2559_s2, 256, %s146_s25, [#allocation8]  }
  0x2a   : > { %s1963_s7 = sadd.s32 1, %s1851_s15   ;;  %s27_s8 = sadd.s32 1, %s1847_s14 }
  0x2b   : > { %s24_s9 = ssub.s32 %s1851_s15, %s1963_s7  ;;  %p34_p1 = scmp.ne.s32.totalorder %s1847_s14, %s1843_s13 }
  0x2c   : > { %p25_p2 = scmp.eq.s32.totalorder %s24_s9, 0  ;;  %p35_p6 = scmp.eq.s32.totalorder %s1851_s15, 0 }
  0x2d   : > { %p2569_p12 = scmp.eq.s32.totalorder %s1912_s16, 1  ;;  %p1618_p7 = scmp.lt.s32.totalorder %s1851_s15, 2 }
  0x2e   : > { %s1979_s11 = scalar_select %p25_p2, %s1847_s14, %s27_s8  }
  0x2f   : > { %p1973_p3 = por %p2569_p12, %p34_p1  ;;  %p36_p9 = por %p35_p6, %p34_p1 }
  0x30   : > { %s156_s17 = sand.u32 1, %s1847_s14   ;;  %s1585_s22 = smul.u32 768, %s1851_s15 }
  0x31   : > { %s2570_s10 = scalar_select %p1973_p3, 1, 0 }
  0x32   : > { %s1584_s21 = smul.u32 48, %s156_s17  ;;  %p1983_p11 = pnand %p1618_p7, %p36_p9 }
  0x33   : > { %s1990_s26 = scalar_lea.hbm %s2557_s0, %s1585_s22  ;;  %s1994_s29 = scalar_lea.sflag [#allocation5], %s156_s17 }
  0x34   : > { %s160_s27 = scalar_lea.vmem [#allocation4], %s1584_s21  ;;  %s1755_s30 = scalar_lea.hbm %s1990_s26, 768 }
  0x35   : > { %s167_s28 = sshll.u32 %s160_s27, 4  ;;  %p1756_p13 = scmp.ne.s32.totalorder %s1990_s26, %s1755_s30  ;;  %s1992_s28 = int_to_ptr.vmem [resolvable:$true] %s167_s28 }
  0x36   : > { %p1757_p0 = pneg %p1983_p11  ;;  %s1760_s6 = scalar_lea.hbm %s2557_s0, 1536 }
  0x37   : > { %p1761_p1 = scmp.lt.s32.totalorder %s1990_s26, %s2557_s0  ;;  %p1762_p2 = scmp.lt.s32.totalorder %s1760_s6, %s1755_s30 }
  0x38   : > { %p1758_p5 = pnand %p1757_p0, %p1756_p13 }
  0x39   : > { %p1763_p6 = por %p1762_p2, %p1761_p1 }
  0x3a   : > { %p1759_p10 = pneg %p1758_p5 }
  0x3c   : > { %p1764_p12 = pnand %p1763_p6, %p1759_p10 }
  0x3e   : > { %1767 = shalt.err (!%p1764_p12)
}
  0x3f   : > { %s1768_s17 = scalar_lea.vmem %s1992_s28, 768  ;;  %s1857_s21 = smov [#allocation4]  }
  0x40   : > { %p1769_p7 = scmp.ne.s32.totalorder %s1992_s28, %s1768_s17  ;;  %s1773_s22 = sshll.u32 %s1857_s21, 4  ;;  %s1774_s22 = int_to_ptr.vmem [resolvable:$false] %s1773_s22 }
  0x41   : > { %s1775_s24 = scalar_lea.vmem %s1774_s22, 1536  ;;  %p1776_p5 = scmp.lt.s32.totalorder %s1992_s28, %s1774_s22 }
  0x42   : > { %p1771_p9 = pnand %p1769_p7, %p1757_p0  ;;  %p1777_p3 = scmp.lt.s32.totalorder %s1775_s24, %s1768_s17 }
  0x44   : > { %p1772_p13 = pneg %p1771_p9  ;;  %p1778_p4 = por %p1777_p3, %p1776_p5 }
  0x46   : > { %p1779_p8 = pnand %p1778_p4, %p1772_p13 }
  0x48   : > { %1782 = shalt.err (!%p1779_p8)
}
  0x49   : > { %s1858_s25 = smov 384   ;;  %s1859_s27 = smov 24  }
  0x4a   : > { %1611 = dma.hbm_to_vmem [thread:$0]  (!%p1983_p11), %s1990_s26, 768, %s1992_s28, %s1994_s29, %s1858_s25, %s1858_s25, %s1859_s27  }
  0x4b   : > { %p2572_p0 = scmp.ne.s32.totalorder %s2567_s20, 0 }
  0x4c   : > { %s2018_s30 = sand.u32 (!%p2572_p0), 1, %s1843_s13   ;;  %p2573_p4 = scmp.ne.s32.totalorder (!%p2572_p0), %s2565_s18, 0 }
  0x4d   : > { %179 = sbr.rel (%p2572_p0) target bundleno = 1290 (0x50a), region = 32  ;;  %s182_s5 = scalar_lea.sflag (!%p2572_p0), [#allocation5], %s2018_s30 }
  0x4e   : > { %s1586_s4 = smul.u32 (!%p2572_p0), 48, %s2018_s30 }
  0x50   : > { %s2022_s6 = scalar_lea.vmem (!%p2572_p0), [#allocation4], %s1586_s4 }
  0x52   : > { %1826 = dma.done.wait (%p2573_p4), %s182_s5, 768  }
  0x53   : > { %1828 = vsyncadd (%p2573_p4), %s182_s5, 4294966528  ;;  %p2574_p8 = scmp.eq.s32.totalorder %s1912_s16, 0 }
  0x55   : > { %1830 = dma.done.wait (%p2574_p8), [#allocation8], 1024   ;;  %p2575_p3 = pmov %p2574_p8 }
  0x56   : > { %v1860_v0 = vmov 0.0   ;;  %v2036_v1 = vld [vmem:[%s2022_s6 + $0x20] sm:$0xff]  ;;  %v2039_v2 = vld [vmem:[%s2022_s6 + $0x18] sm:$0xff]  ;;  %v2042_v3 = vld [vmem:[%s2022_s6 + $0x28] sm:$0xff]  ;;  %vm224_vm0 = vcmask 556032   ;;  %s1861_s18 = smov 91  }
  0x57   : > { %1832 = vsyncadd (%p2575_p3), [#allocation8], 4294966272  ;;  %710 = vmatprep.subr.mxu1 %v1860_v0  ;;  %829 = vst [vmem:[#allocation3] sm:$0xff] %v1860_v0  ;;  %495 = vrot.lane.b32.xlu0 %v2036_v1, %s1861_s18  ;;  %v2049_v4 = vld [vmem:[%s2022_s6 + $0x10] sm:$0xff]  ;;  %v2054_v5 = vld [vmem:[%s2022_s6 + $0x8] sm:$0xff]  ;;  %s1862_s20 = smov 92  }
  0x58   : > { %833 = vst [vmem:[#allocation3 + $0x18] sm:$0xff] %v1860_v0  ;;  %493 = vrot.lane.b32.xlu1 %v2039_v2, %s1861_s18  ;;  %228 = vst.msk [vmem:[#allocation2 + $0x28] sm:$0xff] %vm224_vm0, %v2042_v3  ;;  %v2063_v6 = vld [vmem:[%s2022_s6] sm:$0xff]  ;;  %s1863_s23 = smov 108   ;;  %s1864_s26 = smov 109   ;;  %vm831_vm1 = vcmask 867328  }
  0x59   : > { %225 = vst.msk [vmem:[#allocation2 + $0x10] sm:$0xff] %vm224_vm0, %v2049_v4  ;;  %s1865_s28 = smov 110   ;;  %s1866_s29 = smov 126   ;;  %v558_v7 = vld [vmem:[#allocation7 + $0x8] sm:$0xff]  ;;  %vm617_vm2 = vcmask 130048   ;;  %vm499_vm3 = vcmask 744448  }
  0x5a   : > { %s1867_s8 = smov 127   ;;  %835 = vst.msk [vmem:[#allocation3 + $0x28] sm:$0xff] %vm831_vm1, %v1860_v0  ;;  %832 = vst.msk [vmem:[#allocation3 + $0x10] sm:$0xff] %vm831_vm1, %v1860_v0  ;;  %1567 = vmatprep.mubr.msk.f32.mxu0 %vm617_vm2, %v558_v7  ;;  %1570 = vmatprep.mubr.msk.f32.mxu1 %vm617_vm2, %v558_v7  ;;  %s1868_s9 = smov 90   ;;  %vm458_vm4 = vcmask 752640   ;;  %vm417_vm5 = vcmask 883712  }
  0x5b   : > { %497 = vrot.lane.b32.xlu0 %v2042_v3, %s1861_s18  ;;  %vm376_vm6 = vcmask 891904   ;;  %vm335_vm7 = vcmask 900096   ;;  %vm294_vm8 = vcmask 1031168   ;;  %vm253_vm9 = vcmask 1039360   ;;  %s1869_s17 = smov 19   ;;  %s1587_s21 = smul.u32 24, %s2018_s30 }
  0x5c   : > { %489 = vrot.lane.b32.xlu1 %v2054_v5, %s1861_s18  ;;  %vm540_vm10 = vcmask 736256   ;;  %vm854_vm11 = vcmask 1047704   ;;  %vm845_vm12 = vcmask 154624   ;;  %vm857_vm13 = vcmask 711680   ;;  %s1588_s22 = smul.u32 384, %s1912_s16  ;;  %s1455_s16 = scalar_lea.sflag [#allocation6], %s2018_s30 }
  0x5d   : > { %s215_s24 = scalar_lea.vmem [#allocation10], %s1587_s21  ;;  %p2576_p10 = scmp.ne.s32.totalorder %s2570_s10, 0 }
  0x5e   : > { %s1469_s25 = sshll.u32 %s215_s24, 4  ;;  %s2512_s5 = scalar_lea.hbm %s2560_s3, %s1588_s22  ;;  %s2514_s25 = int_to_ptr.vmem [resolvable:$true] %s1469_s25 }
  0x5f   : > { %491 = vrot.lane.b32.xlu0 %v2049_v4, %s1861_s18  ;;  %v2149_v8 = vld [vmem:[#allocation2 + $0x28] sm:$0xff] }
  0x60   : > { %487 = vrot.lane.b32.xlu1 %v2063_v6, %s1861_s18 }
  0x61   : > { %v2151_v9 = vld [vmem:[#allocation3 + $0x28] sm:$0xff] }
  0x62   : > { %870 = vst.msk [vmem:[#allocation2 + $0x28] sm:$0xff] %vm224_vm0, %v2151_v9 }
  0x63   : > { %454 = vrot.lane.b32.xlu0 %v2036_v1, %s1862_s20 }
  0x64   : > { %456 = vrot.lane.b32.xlu1 %v2042_v3, %s1862_s20 }
  0x67   : > { %452 = vrot.lane.b32.xlu0 %v2039_v2, %s1862_s20 }
  0x68   : > { %448 = vrot.lane.b32.xlu1 %v2054_v5, %s1862_s20 }
  0x6b   : > { %450 = vrot.lane.b32.xlu0 %v2049_v4, %s1862_s20 }
  0x6c   : > { %446 = vrot.lane.b32.xlu1 %v2063_v6, %s1862_s20 }
  0x6f   : > { %413 = vrot.lane.b32.xlu0 %v2036_v1, %s1863_s23 }
  0x70   : > { %415 = vrot.lane.b32.xlu1 %v2042_v3, %s1863_s23 }
  0x73   : > { %411 = vrot.lane.b32.xlu0 %v2039_v2, %s1863_s23 }
  0x74   : > { %407 = vrot.lane.b32.xlu1 %v2054_v5, %s1863_s23 }
  0x77   : > { %409 = vrot.lane.b32.xlu0 %v2049_v4, %s1863_s23 }
  0x78   : > { %405 = vrot.lane.b32.xlu1 %v2063_v6, %s1863_s23 }
  0x7b   : > { %372 = vrot.lane.b32.xlu0 %v2036_v1, %s1864_s26 }
  0x7c   : > { %374 = vrot.lane.b32.xlu1 %v2042_v3, %s1864_s26 }
  0x7f   : > { %370 = vrot.lane.b32.xlu0 %v2039_v2, %s1864_s26 }
  0x80   : > { %366 = vrot.lane.b32.xlu1 %v2054_v5, %s1864_s26 }
  0x83   : > { %368 = vrot.lane.b32.xlu0 %v2049_v4, %s1864_s26 }
  0x84   : > { %364 = vrot.lane.b32.xlu1 %v2063_v6, %s1864_s26 }
  0x87   : > { %331 = vrot.lane.b32.xlu0 %v2036_v1, %s1865_s28 }
  0x88   : > { %333 = vrot.lane.b32.xlu1 %v2042_v3, %s1865_s28 }
  0x8b   : > { %329 = vrot.lane.b32.xlu0 %v2039_v2, %s1865_s28 }
  0x8c   : > { %325 = vrot.lane.b32.xlu1 %v2054_v5, %s1865_s28 }
  0x8f   : > { %327 = vrot.lane.b32.xlu0 %v2049_v4, %s1865_s28 }
  0x90   : > { %323 = vrot.lane.b32.xlu1 %v2063_v6, %s1865_s28 }
  0x93   : > { %290 = vrot.lane.b32.xlu0 %v2036_v1, %s1866_s29 }
  0x94   : > { %292 = vrot.lane.b32.xlu1 %v2042_v3, %s1866_s29 }
  0x97   : > { %288 = vrot.lane.b32.xlu0 %v2039_v2, %s1866_s29 }
  0x98   : > { %284 = vrot.lane.b32.xlu1 %v2054_v5, %s1866_s29 }
  0x9b   : > { %286 = vrot.lane.b32.xlu0 %v2049_v4, %s1866_s29 }
  0x9c   : > { %282 = vrot.lane.b32.xlu1 %v2063_v6, %s1866_s29 }
  0x9f   : > { %249 = vrot.lane.b32.xlu0 %v2036_v1, %s1867_s8 }
  0xa0   : > { %251 = vrot.lane.b32.xlu1 %v2042_v3, %s1867_s8 }
  0xa3   : > { %247 = vrot.lane.b32.xlu0 %v2039_v2, %s1867_s8 }
  0xa4   : > { %243 = vrot.lane.b32.xlu1 %v2054_v5, %s1867_s8 }
  0xa7   : > { %245 = vrot.lane.b32.xlu0 %v2049_v4, %s1867_s8 }
  0xa8   : > { %241 = vrot.lane.b32.xlu1 %v2063_v6, %s1867_s8 }
  0xab   : > { %536 = vrot.lane.b32.xlu0 %v2036_v1, %s1868_s9 }
  0xac   : > { %538 = vrot.lane.b32.xlu1 %v2042_v3, %s1868_s9 }
  0xaf   : > { %534 = vrot.lane.b32.xlu0 %v2039_v2, %s1868_s9 }
  0xb0   : > { %530 = vrot.lane.b32.xlu1 %v2054_v5, %s1868_s9 }
  0xb3   : > { %532 = vrot.lane.b32.xlu0 %v2049_v4, %s1868_s9 }
  0xb4   : > { %528 = vrot.lane.b32.xlu1 %v2063_v6, %s1868_s9 }
  0xc9   : > { %v496_v10 = vpop.permute.xlu0 %495 }
  0xca   : > { %v494_v11 = vpop.permute.xlu1 %493 }
  0xcb   : > { %v502_v15 = vsel %vm499_vm3, %v494_v11, %v496_v10 }
  0xcd   : > { %v498_v12 = vpop.permute.xlu0 %497 }
  0xce   : > { %v490_v13 = vpop.permute.xlu1 %489  ;;  %v503_v14 = vsel %vm499_vm3, %v496_v10, %v498_v12  ;;  %515 = vst.msk [vmem:[#allocation2 + $0x178] sm:$0xff] %vm224_vm0, %v498_v12 }
  0xcf   : > { %627 = vmatprep.subr.mxu0 %v503_v14 }
  0xd0   : > { %628 = vmatpush1.msra.mxu0 %v502_v15 }
  0xd1   : > { %v492_v16 = vpop.permute.xlu0 %491 }
  0xd2   : > { %v488_v17 = vpop.permute.xlu1 %487  ;;  %v501_v18 = vsel %vm499_vm3, %v490_v13, %v492_v16  ;;  %512 = vst.msk [vmem:[#allocation2 + $0x160] sm:$0xff] %vm224_vm0, %v492_v16 }
  0xd3   : > { %v500_v19 = vsel %vm499_vm3, %v488_v17, %v490_v13  ;;  %629 = vmatprep.subr.mxu0 %v501_v18 }
  0xd4   : > { %630 = vmatpush1.msra.mxu0 %v500_v19 }
  0xd5   : > { %v455_v21 = vpop.permute.xlu0 %454  ;;  %v610_v22 = vld [vmem:[#allocation2 + $0x178] sm:$0xff] }
  0xd6   : > { %v457_v20 = vpop.permute.xlu1 %456  ;;  %711 = vmatpush1.msra.mxu1 %v610_v22 }
  0xd7   : > { %474 = vst.msk [vmem:[#allocation2 + $0x148] sm:$0xff] %vm224_vm0, %v457_v20  ;;  %v462_v23 = vsel %vm458_vm4, %v455_v21, %v457_v20  ;;  %712 = vmatprep.subr.mxu1 %v1860_v0 }
  0xd8   : > { %631 = vmatprep.subr.mxu0 %v462_v23 }
  0xd9   : > { %v453_v24 = vpop.permute.xlu0 %452  ;;  %v607_v26 = vld [vmem:[#allocation2 + $0x160] sm:$0xff] }
  0xda   : > { %v449_v25 = vpop.permute.xlu1 %448  ;;  %v461_v27 = vsel %vm458_vm4, %v453_v24, %v455_v21  ;;  %713 = vmatpush1.msra.mxu1 %v607_v26 }
  0xdb   : > { %714 = vmatprep.subr.mxu1 %v1860_v0  ;;  %632 = vmatpush1.msra.mxu0 %v461_v27 }
  0xdd   : > { %v451_v28 = vpop.permute.xlu0 %450 }
  0xde   : > { %v447_v29 = vpop.permute.xlu1 %446  ;;  %v604_v30 = vld [vmem:[#allocation2 + $0x148] sm:$0xff]  ;;  %v460_v31 = vsel %vm458_vm4, %v449_v25, %v451_v28  ;;  %471 = vst.msk [vmem:[#allocation2 + $0x130] sm:$0xff] %vm224_vm0, %v451_v28 }
  0xdf   : > { %v459_v32 = vsel %vm458_vm4, %v447_v29, %v449_v25  ;;  %715 = vmatpush1.msra.mxu1 %v604_v30  ;;  %633 = vmatprep.subr.mxu0 %v460_v31 }
  0xe0   : > { %716 = vmatprep.subr.mxu1 %v1860_v0  ;;  %634 = vmatpush1.msra.mxu0 %v459_v32 }
  0xe1   : > { %v414_v34 = vpop.permute.xlu0 %413 }
  0xe2   : > { %v416_v33 = vpop.permute.xlu1 %415 }
  0xe3   : > { %433 = vst.msk [vmem:[#allocation2 + $0x118] sm:$0xff] %vm224_vm0, %v416_v33  ;;  %v421_v35 = vsel %vm417_vm5, %v414_v34, %v416_v33 }
  0xe4   : > { %635 = vmatprep.subr.mxu0 %v421_v35 }
  0xe5   : > { %v412_v36 = vpop.permute.xlu0 %411  ;;  %v601_v38 = vld [vmem:[#allocation2 + $0x130] sm:$0xff] }
  0xe6   : > { %v408_v37 = vpop.permute.xlu1 %407  ;;  %v420_v39 = vsel %vm417_vm5, %v412_v36, %v414_v34  ;;  %717 = vmatpush1.msra.mxu1 %v601_v38 }
  0xe7   : > { %718 = vmatprep.subr.mxu1 %v1860_v0  ;;  %636 = vmatpush1.msra.mxu0 %v420_v39 }
  0xe9   : > { %v410_v40 = vpop.permute.xlu0 %409 }
  0xea   : > { %v406_v41 = vpop.permute.xlu1 %405  ;;  %v598_v42 = vld [vmem:[#allocation2 + $0x118] sm:$0xff]  ;;  %v419_v43 = vsel %vm417_vm5, %v408_v37, %v410_v40  ;;  %430 = vst.msk [vmem:[#allocation2 + $0x100] sm:$0xff] %vm224_vm0, %v410_v40 }
  0xeb   : > { %v418_v44 = vsel %vm417_vm5, %v406_v41, %v408_v37  ;;  %719 = vmatpush1.msra.mxu1 %v598_v42  ;;  %637 = vmatprep.subr.mxu0 %v419_v43 }
  0xec   : > { %720 = vmatprep.subr.mxu1 %v1860_v0  ;;  %638 = vmatpush1.msra.mxu0 %v418_v44 }
  0xed   : > { %v373_v46 = vpop.permute.xlu0 %372 }
  0xee   : > { %v375_v45 = vpop.permute.xlu1 %374 }
  0xef   : > { %392 = vst.msk [vmem:[#allocation2 + $0xe8] sm:$0xff] %vm224_vm0, %v375_v45  ;;  %v380_v47 = vsel %vm376_vm6, %v373_v46, %v375_v45 }
  0xf0   : > { %639 = vmatprep.subr.mxu0 %v380_v47 }
  0xf1   : > { %v371_v48 = vpop.permute.xlu0 %370  ;;  %v595_v50 = vld [vmem:[#allocation2 + $0x100] sm:$0xff] }
  0xf2   : > { %v367_v49 = vpop.permute.xlu1 %366  ;;  %v379_v51 = vsel %vm376_vm6, %v371_v48, %v373_v46  ;;  %721 = vmatpush1.msra.mxu1 %v595_v50  ;;  %v557_v48 = vld [vmem:[#allocation7] sm:$0xff] }
  0xf3   : > { %722 = vmatprep.subr.mxu1 %v1860_v0  ;;  %640 = vmatpush1.msra.mxu0 %v379_v51 }
  0xf5   : > { %v369_v52 = vpop.permute.xlu0 %368 }
  0xf6   : > { %v365_v53 = vpop.permute.xlu1 %364  ;;  %v592_v54 = vld [vmem:[#allocation2 + $0xe8] sm:$0xff]  ;;  %v378_v55 = vsel %vm376_vm6, %v367_v49, %v369_v52  ;;  %389 = vst.msk [vmem:[#allocation2 + $0xd0] sm:$0xff] %vm224_vm0, %v369_v52 }
  0xf7   : > { %v377_v56 = vsel %vm376_vm6, %v365_v53, %v367_v49  ;;  %723 = vmatpush1.msra.mxu1 %v592_v54  ;;  %641 = vmatprep.subr.mxu0 %v378_v55 }
  0xf8   : > { %724 = vmatprep.subr.mxu1 %v1860_v0  ;;  %642 = vmatpush1.msra.mxu0 %v377_v56 }
  0xf9   : > { %v332_v58 = vpop.permute.xlu0 %331 }
  0xfa   : > { %v334_v57 = vpop.permute.xlu1 %333 }
  0xfb   : > { %351 = vst.msk [vmem:[#allocation2 + $0xb8] sm:$0xff] %vm224_vm0, %v334_v57  ;;  %v339_v59 = vsel %vm335_vm7, %v332_v58, %v334_v57 }
  0xfc   : > { %643 = vmatprep.subr.mxu0 %v339_v59 }
  0xfd   : > { %v330_v60 = vpop.permute.xlu0 %329  ;;  %v589_v62 = vld [vmem:[#allocation2 + $0xd0] sm:$0xff] }
  0xfe   : > { %v326_v61 = vpop.permute.xlu1 %325  ;;  %v338_v63 = vsel %vm335_vm7, %v330_v60, %v332_v58  ;;  %725 = vmatpush1.msra.mxu1 %v589_v62 }
  0xff   : > { %726 = vmatprep.subr.mxu1 %v1860_v0  ;;  %644 = vmatpush1.msra.mxu0 %v338_v63 }
 0x101   : > { %v328_v3 = vpop.permute.xlu0 %327 }
 0x102   : > { %v324_v7 = vpop.permute.xlu1 %323  ;;  %v586_v10 = vld [vmem:[#allocation2 + $0xb8] sm:$0xff]  ;;  %v337_v11 = vsel %vm335_vm7, %v326_v61, %v328_v3  ;;  %348 = vst.msk [vmem:[#allocation2 + $0xa0] sm:$0xff] %vm224_vm0, %v328_v3 }
 0x103   : > { %v336_v12 = vsel %vm335_vm7, %v324_v7, %v326_v61  ;;  %727 = vmatpush1.msra.mxu1 %v586_v10  ;;  %645 = vmatprep.subr.mxu0 %v337_v11 }
 0x104   : > { %728 = vmatprep.subr.mxu1 %v1860_v0  ;;  %646 = vmatpush1.msra.mxu0 %v336_v12 }
 0x105   : > { %v291_v14 = vpop.permute.xlu0 %290 }
 0x106   : > { %v293_v13 = vpop.permute.xlu1 %292 }
 0x107   : > { %310 = vst.msk [vmem:[#allocation2 + $0x88] sm:$0xff] %vm224_vm0, %v293_v13  ;;  %v298_v15 = vsel %vm294_vm8, %v291_v14, %v293_v13 }
 0x108   : > { %647 = vmatprep.subr.mxu0 %v298_v15 }
 0x109   : > { %v289_v16 = vpop.permute.xlu0 %288  ;;  %v583_v18 = vld [vmem:[#allocation2 + $0xa0] sm:$0xff] }
 0x10a   : > { %v285_v17 = vpop.permute.xlu1 %284  ;;  %v297_v19 = vsel %vm294_vm8, %v289_v16, %v291_v14  ;;  %729 = vmatpush1.msra.mxu1 %v583_v18 }
 0x10b   : > { %730 = vmatprep.subr.mxu1 %v1860_v0  ;;  %648 = vmatpush1.msra.mxu0 %v297_v19 }
 0x10d   : > { %v287_v20 = vpop.permute.xlu0 %286 }
 0x10e   : > { %v283_v21 = vpop.permute.xlu1 %282  ;;  %v580_v22 = vld [vmem:[#allocation2 + $0x88] sm:$0xff]  ;;  %v296_v23 = vsel %vm294_vm8, %v285_v17, %v287_v20  ;;  %307 = vst.msk [vmem:[#allocation2 + $0x70] sm:$0xff] %vm224_vm0, %v287_v20 }
 0x10f   : > { %v295_v24 = vsel %vm294_vm8, %v283_v21, %v285_v17  ;;  %731 = vmatpush1.msra.mxu1 %v580_v22  ;;  %649 = vmatprep.subr.mxu0 %v296_v23 }
 0x110   : > { %732 = vmatprep.subr.mxu1 %v1860_v0  ;;  %650 = vmatpush1.msra.mxu0 %v295_v24 }
 0x111   : > { %v250_v26 = vpop.permute.xlu0 %249 }
 0x112   : > { %v252_v25 = vpop.permute.xlu1 %251 }
 0x113   : > { %269 = vst.msk [vmem:[#allocation2 + $0x58] sm:$0xff] %vm224_vm0, %v252_v25  ;;  %v257_v27 = vsel %vm253_vm9, %v250_v26, %v252_v25 }
 0x114   : > { %651 = vmatprep.subr.mxu0 %v257_v27 }
 0x115   : > { %v248_v28 = vpop.permute.xlu0 %247  ;;  %v577_v30 = vld [vmem:[#allocation2 + $0x70] sm:$0xff] }
 0x116   : > { %v244_v29 = vpop.permute.xlu1 %243  ;;  %v256_v31 = vsel %vm253_vm9, %v248_v28, %v250_v26  ;;  %733 = vmatpush1.msra.mxu1 %v577_v30 }
 0x117   : > { %734 = vmatprep.subr.mxu1 %v1860_v0  ;;  %652 = vmatpush1.msra.mxu0 %v256_v31 }
 0x119   : > { %v246_v32 = vpop.permute.xlu0 %245 }
 0x11a   : > { %v242_v33 = vpop.permute.xlu1 %241  ;;  %v574_v34 = vld [vmem:[#allocation2 + $0x58] sm:$0xff]  ;;  %v255_v35 = vsel %vm253_vm9, %v244_v29, %v246_v32  ;;  %266 = vst.msk [vmem:[#allocation2 + $0x40] sm:$0xff] %vm224_vm0, %v246_v32 }
 0x11b   : > { %v254_v36 = vsel %vm253_vm9, %v242_v33, %v244_v29  ;;  %735 = vmatpush1.msra.mxu1 %v574_v34  ;;  %653 = vmatprep.subr.mxu0 %v255_v35 }
 0x11c   : > { %736 = vmatprep.subr.mxu1 %v1860_v0  ;;  %654 = vmatpush1.msra.mxu0 %v254_v36 }
 0x11d   : > { %v537_v37 = vpop.permute.xlu0 %536  ;;  %655 = vmatprep.subr.mxu0 %v2036_v1  ;;  %v565_v1 = vld [vmem:[#allocation2 + $0x10] sm:$0xff] }
 0x11e   : > { %v539_v38 = vpop.permute.xlu1 %538  ;;  %656 = vmatpush1.msra.mxu0 %v2039_v2 }
 0x11f   : > { %556 = vst.msk [vmem:[#allocation2 + $0x1a8] sm:$0xff] %vm224_vm0, %v539_v38  ;;  %657 = vmatprep.subr.mxu0 %v2054_v5  ;;  %v544_v39 = vsel %vm540_vm10, %v537_v37, %v539_v38 }
 0x120   : > { %658 = vmatpush1.msra.mxu0 %v2063_v6 }
 0x121   : > { %v535_v40 = vpop.permute.xlu0 %534  ;;  %v571_v42 = vld [vmem:[#allocation2 + $0x40] sm:$0xff]  ;;  %687 = vmatprep.subr.mxu0 %v544_v39 }
 0x122   : > { %v531_v41 = vpop.permute.xlu1 %530  ;;  %v543_v43 = vsel %vm540_vm10, %v535_v40, %v537_v37  ;;  %737 = vmatpush1.msra.mxu1 %v571_v42  ;;  %v559_v42 = vld [vmem:[#allocation7 + $0x10] sm:$0xff] }
 0x123   : > { %738 = vmatprep.subr.mxu1 %v1860_v0  ;;  %688 = vmatpush2.msra.mxu0 %v543_v43 }
 0x124   : > { %739 = vmatpush1.msra.mxu1 %v2149_v8 }
 0x125   : > { %v533_v2 = vpop.permute.xlu0 %532  ;;  %740 = vmatprep.subr.mxu1 %v1860_v0 }
 0x126   : > { %v529_v44 = vpop.permute.xlu1 %528  ;;  %v616_v45 = vld [vmem:[#allocation2 + $0x1a8] sm:$0xff]  ;;  %v542_v46 = vsel %vm540_vm10, %v531_v41, %v533_v2  ;;  %553 = vst.msk [vmem:[#allocation2 + $0x190] sm:$0xff] %vm224_vm0, %v533_v2  ;;  %741 = vmatpush1.msra.mxu1 %v565_v1 }
 0x127   : > { %v541_v47 = vsel %vm540_vm10, %v529_v44, %v531_v41  ;;  %770 = vmatprep.subr.mxu1 %v1860_v0  ;;  %689 = vmatprep.subr.mxu0 %v542_v46  ;;  %v560_v41 = vld [vmem:[#allocation7 + $0x18] sm:$0xff] }
 0x128   : > { %771 = vmatpush2.msra.mxu1 %v616_v45  ;;  %690 = vmatpush2.msra.mxu0 %v541_v47 }
 0x129   : > { %772 = vmatprep.subr.mxu1 %v1860_v0  ;;  %692 = vmatmul.mubr.f32.vlgmr.msra.gmra.mxu0 %v557_v48 }
 0x12a   : > { %1568 = vmatprep.mubr.msk.f32.mxu0 %vm617_vm2, %v560_v41 }
 0x12d   : > { %v613_v8 = vld [vmem:[#allocation2 + $0x190] sm:$0xff]  ;;  %698 = vmatmul.mubr.f32.gmra.mxu0 %v559_v42 }
 0x12e   : > { %773 = vmatpush2.msra.mxu1 %v613_v8 }
 0x12f   : > { %775 = vmatmul.mubr.f32.vlgmr.msra.gmra.mxu1 %v557_v48  ;;  %1321 = vmatprep.subr.mxu1 %v1860_v0 }
 0x130   : > { %1571 = vmatprep.mubr.msk.f32.mxu1 %vm617_vm2, %v560_v41 }
 0x133   : > { %780 = vmatmul.mubr.f32.gmra.mxu1 %v559_v42 }
 0x1e9   : > { %v693_v49 = vpop.f32.mrf.mxu0 }
 0x1ea   : > { %v1573_v50 = vmul.f32 -1.442695, %v693_v49 }
 0x1eb   : > { %v695_v51 = vpop.f32.mrf.mxu0 }
 0x1ec   : > { %1670 = vpow2.f32 %v1573_v50  ;;  %v1574_v52 = vmul.f32 -1.442695, %v695_v51  ;;  %v562_v50 = vld [vmem:[#allocation7 + $0x28] sm:$0xff]  ;;  %v561_v51 = vld [vmem:[#allocation7 + $0x20] sm:$0xff] }
 0x1ed   : > { %1569 = vmatprep.mubr.msk.f32.mxu0 %vm617_vm2, %v562_v50  ;;  %1572 = vmatprep.mubr.msk.f32.mxu1 %vm617_vm2, %v562_v50 }
 0x1ee   : > { %1672 = vpow2.f32 %v1574_v52  ;;  %704 = vmatmul.mubr.f32.gmra.mxu0 %v561_v51  ;;  %785 = vmatmul.mubr.f32.gmra.mxu1 %v561_v51 }
 0x1ef   : > { %v776_v53 = vpop.f32.mrf.mxu1 }
 0x1f0   : > { %v1575_v54 = vmul.f32 -1.442695, %v776_v53 }
 0x1f1   : > { %v778_v55 = vpop.f32.mrf.mxu1 }
 0x1f2   : > { %1674 = vpow2.f32 %v1575_v54  ;;  %v1192_v54 = vld [vmem:[#allocation9 + $0x8] sm:$0xff] }
 0x1f3   : > { %1579 = vmatprep.mubr.msk.f32.mxu0 %vm617_vm2, %v1192_v54  ;;  %1580 = vmatprep.mubr.msk.f32.mxu1 %vm617_vm2, %v1192_v54 }
 0x1f9   : > { %v1671_v56 = vpop.eup %1670 }
 0x1fa   : > { %v799_v57 = vadd.f32 1.0, %v1671_v56 }
 0x1fb   : > { %v1673_v58 = vpop.eup %1672 }
 0x1fc   : > { %1676 = vrcp.f32 %v799_v57  ;;  %v800_v59 = vadd.f32 1.0, %v1673_v58 }
 0x1fe   : > { %1678 = vrcp.f32 %v800_v59 }
 0x1ff   : > { %v1675_v60 = vpop.eup %1674 }
 0x200   : > { %v801_v61 = vadd.f32 1.0, %v1675_v60 }
 0x202   : > { %1680 = vrcp.f32 %v801_v61 }
 0x209   : > { %v1677_v62 = vpop.eup %1676 }
 0x20a   : > { %839 = vrot.lane.b32.xlu0 %v1677_v62, %s1869_s17 }
 0x20b   : > { %v1679_v63 = vpop.eup %1678 }
 0x20c   : > { %841 = vrot.lane.b32.xlu1 %v1679_v63, %s1869_s17 }
 0x20f   : > { %v1681_v3 = vpop.eup %1680 }
 0x210   : > { %843 = vrot.lane.b32.xlu0 %v1681_v3, %s1869_s17  ;;  %1131 = vrot.lane.b32.xlu1 %v1860_v0, %s1861_s18 }
 0x214   : > { %1129 = vrot.lane.b32.xlu1 %v1860_v0, %s1861_s18  ;;  %1133 = vrot.lane.b32.xlu0 %v2151_v9, %s1861_s18 }
 0x218   : > { %1091 = vrot.lane.b32.xlu1 %v1860_v0, %s1862_s20  ;;  %1093 = vrot.lane.b32.xlu0 %v2151_v9, %s1862_s20 }
 0x21c   : > { %1089 = vrot.lane.b32.xlu1 %v1860_v0, %s1862_s20  ;;  %1053 = vrot.lane.b32.xlu0 %v2151_v9, %s1863_s23 }
 0x220   : > { %1051 = vrot.lane.b32.xlu1 %v1860_v0, %s1863_s23  ;;  %1013 = vrot.lane.b32.xlu0 %v2151_v9, %s1864_s26 }
 0x224   : > { %1049 = vrot.lane.b32.xlu1 %v1860_v0, %s1863_s23  ;;  %973 = vrot.lane.b32.xlu0 %v2151_v9, %s1865_s28 }
 0x228   : > { %1011 = vrot.lane.b32.xlu1 %v1860_v0, %s1864_s26  ;;  %933 = vrot.lane.b32.xlu0 %v2151_v9, %s1866_s29 }
 0x22c   : > { %1009 = vrot.lane.b32.xlu1 %v1860_v0, %s1864_s26  ;;  %893 = vrot.lane.b32.xlu0 %v2151_v9, %s1867_s8 }
 0x230   : > { %971 = vrot.lane.b32.xlu1 %v1860_v0, %s1865_s28 }
 0x234   : > { %969 = vrot.lane.b32.xlu1 %v1860_v0, %s1865_s28 }
 0x238   : > { %931 = vrot.lane.b32.xlu1 %v1860_v0, %s1866_s29 }
 0x23c   : > { %929 = vrot.lane.b32.xlu1 %v1860_v0, %s1866_s29 }
 0x240   : > { %891 = vrot.lane.b32.xlu1 %v1860_v0, %s1867_s8 }
 0x244   : > { %889 = vrot.lane.b32.xlu1 %v1860_v0, %s1867_s8 }
 0x248   : > { %1171 = vrot.lane.b32.xlu1 %v1860_v0, %s1868_s9 }
 0x27c   : > { %v840_v7 = vpop.permute.xlu0 %839 }
 0x27d   : > { %v851_v10 = vmul.f32 %v840_v7, %v2063_v6 }
 0x27e   : > { %v842_v11 = vpop.permute.xlu1 %841 }
 0x27f   : > { %855 = vst.msk [vmem:[#allocation3] sm:$0xff] %vm854_vm11, %v851_v10  ;;  %v846_v12 = vsel %vm845_vm12, %v840_v7, %v842_v11 }
 0x280   : > { %v2284_v13 = vmul.f32 %v846_v12, %v2054_v5 }
 0x282   : > { %v844_v14 = vpop.permute.xlu0 %843  ;;  %v1132_v15 = vpop.permute.xlu1 %1131 }
 0x283   : > { %v847_v16 = vsel %vm845_vm12, %v842_v11, %v844_v14 }
 0x284   : > { %v853_v17 = vmul.f32 %v847_v16, %v2049_v4 }
 0x286   : > { %858 = vst.msk [vmem:[#allocation3 + $0x10] sm:$0xff] %vm857_vm13, %v853_v17  ;;  %v2288_v18 = vld [vmem:[#allocation3] sm:$0xff]  ;;  %v1130_v19 = vpop.permute.xlu1 %1129  ;;  %v1134_v20 = vpop.permute.xlu0 %1133 }
 0x287   : > { %1123 = vrot.lane.b32.xlu0 %v2288_v18, %s1861_s18  ;;  %v1137_v6 = vsel %vm499_vm3, %v1130_v19, %v1132_v15  ;;  %v1138_v5 = vsel %vm499_vm3, %v1132_v15, %v1134_v20  ;;  %1150 = vst.msk [vmem:[#allocation2 + $0x178] sm:$0xff] %vm224_vm0, %v1134_v20 }
 0x288   : > { %1250 = vmatprep.subr.mxu0 %v1138_v5 }
 0x289   : > { %1251 = vmatpush1.msra.mxu0 %v1137_v6 }
 0x28a   : > { %v1092_v21 = vpop.permute.xlu1 %1091  ;;  %v1094_v22 = vpop.permute.xlu0 %1093 }
 0x28b   : > { %1083 = vrot.lane.b32.xlu0 %v2288_v18, %s1862_s20  ;;  %v2298_v23 = vsel %vm458_vm4, %v1092_v21, %v1094_v22  ;;  %1110 = vst.msk [vmem:[#allocation2 + $0x148] sm:$0xff] %vm224_vm0, %v1094_v22 }
 0x28d   : > { %v1113_v24 = vld [vmem:[#allocation3 + $0x10] sm:$0xff] }
 0x28e   : > { %1127 = vrot.lane.b32.xlu1 %v1113_v24, %s1861_s18  ;;  %v1090_v25 = vpop.permute.xlu1 %1089  ;;  %v1054_v26 = vpop.permute.xlu0 %1053  ;;  %v1240_v27 = vld [vmem:[#allocation2 + $0x178] sm:$0xff]  ;;  %867 = vst.msk [vmem:[#allocation2 + $0x10] sm:$0xff] %vm224_vm0, %v1113_v24 }
 0x28f   : > { %1043 = vrot.lane.b32.xlu0 %v2288_v18, %s1863_s23  ;;  %v2306_v28 = vsel %vm458_vm4, %v1090_v25, %v1092_v21  ;;  %1070 = vst.msk [vmem:[#allocation2 + $0x118] sm:$0xff] %vm224_vm0, %v1054_v26  ;;  %1322 = vmatpush1.msra.mxu1 %v1240_v27 }
 0x290   : > { %1323 = vmatprep.subr.mxu1 %v1860_v0 }
 0x292   : > { %1087 = vrot.lane.b32.xlu1 %v1113_v24, %s1862_s20  ;;  %v1052_v29 = vpop.permute.xlu1 %1051  ;;  %v1014_v30 = vpop.permute.xlu0 %1013  ;;  %v1234_v3 = vld [vmem:[#allocation2 + $0x148] sm:$0xff] }
 0x293   : > { %1003 = vrot.lane.b32.xlu0 %v2288_v18, %s1864_s26  ;;  %v2314_v31 = vsel %vm417_vm5, %v1052_v29, %v1054_v26  ;;  %1030 = vst.msk [vmem:[#allocation2 + $0xe8] sm:$0xff] %vm224_vm0, %v1014_v30 }
 0x296   : > { %1047 = vrot.lane.b32.xlu1 %v1113_v24, %s1863_s23  ;;  %v1050_v32 = vpop.permute.xlu1 %1049  ;;  %v974_v33 = vpop.permute.xlu0 %973  ;;  %v1228_v12 = vld [vmem:[#allocation2 + $0x118] sm:$0xff] }
 0x297   : > { %963 = vrot.lane.b32.xlu0 %v2288_v18, %s1865_s28  ;;  %v2321_v34 = vsel %vm417_vm5, %v1050_v32, %v1052_v29  ;;  %990 = vst.msk [vmem:[#allocation2 + $0xb8] sm:$0xff] %vm224_vm0, %v974_v33 }
 0x29a   : > { %1007 = vrot.lane.b32.xlu1 %v1113_v24, %s1864_s26  ;;  %v1012_v35 = vpop.permute.xlu1 %1011  ;;  %v934_v36 = vpop.permute.xlu0 %933  ;;  %v1222_v17 = vld [vmem:[#allocation2 + $0xe8] sm:$0xff] }
 0x29b   : > { %923 = vrot.lane.b32.xlu0 %v2288_v18, %s1866_s29  ;;  %v2328_v37 = vsel %vm376_vm6, %v1012_v35, %v1014_v30  ;;  %950 = vst.msk [vmem:[#allocation2 + $0x88] sm:$0xff] %vm224_vm0, %v934_v36 }
 0x29e   : > { %967 = vrot.lane.b32.xlu1 %v1113_v24, %s1865_s28  ;;  %v1010_v38 = vpop.permute.xlu1 %1009  ;;  %v894_v39 = vpop.permute.xlu0 %893  ;;  %v1216_v22 = vld [vmem:[#allocation2 + $0xb8] sm:$0xff] }
 0x29f   : > { %883 = vrot.lane.b32.xlu0 %v2288_v18, %s1867_s8  ;;  %v2335_v40 = vsel %vm376_vm6, %v1010_v38, %v1012_v35  ;;  %910 = vst.msk [vmem:[#allocation2 + $0x58] sm:$0xff] %vm224_vm0, %v894_v39 }
 0x2a2   : > { %927 = vrot.lane.b32.xlu1 %v1113_v24, %s1866_s29  ;;  %v972_v43 = vpop.permute.xlu1 %971  ;;  %v1210_v30 = vld [vmem:[#allocation2 + $0x88] sm:$0xff] }
 0x2a3   : > { %1125 = vrot.lane.b32.xlu0 %v2284_v13, %s1861_s18  ;;  %v2344_v1 = vsel %vm335_vm7, %v972_v43, %v974_v33  ;;  %s1870_s18 = smov [#allocation10]  }
 0x2a6   : > { %887 = vrot.lane.b32.xlu1 %v1113_v24, %s1867_s8  ;;  %v970_v2 = vpop.permute.xlu1 %969  ;;  %v1204_v38 = vld [vmem:[#allocation2 + $0x58] sm:$0xff] }
 0x2a7   : > { %1085 = vrot.lane.b32.xlu0 %v2284_v13, %s1862_s20  ;;  %v2350_v44 = vsel %vm335_vm7, %v970_v2, %v972_v43  ;;  %v1195_v2 = vld [vmem:[#allocation2 + $0x10] sm:$0xff]  ;;  %s1787_s20 = sshll.u32 %s1870_s18, 4  ;;  %s1788_s20 = int_to_ptr.vmem [resolvable:$false] %s1787_s20 }
 0x2a8   : > { %p1790_p6 = scmp.lt.s32.totalorder %s2514_s25, %s1788_s20 }
 0x2aa   : > { %1169 = vrot.lane.b32.xlu1 %v1860_v0, %s1868_s9  ;;  %v932_v45 = vpop.permute.xlu1 %931 }
 0x2ab   : > { %1045 = vrot.lane.b32.xlu0 %v2284_v13, %s1863_s23  ;;  %v2357_v46 = vsel %vm294_vm8, %v932_v45, %v934_v36  ;;  %v2442_v36 = vld [vmem:[#allocation3 + $0x18] sm:$0xff]  ;;  %s1789_s23 = scalar_lea.vmem %s1788_s20, 768 }
 0x2ae   : > { %1167 = vrot.lane.b32.xlu1 %v1113_v24, %s1868_s9  ;;  %v930_v47 = vpop.permute.xlu1 %929 }
 0x2af   : > { %1005 = vrot.lane.b32.xlu0 %v2284_v13, %s1864_s26  ;;  %v2363_v48 = vsel %vm294_vm8, %v930_v47, %v932_v45 }
 0x2b2   : > { %v892_v8 = vpop.permute.xlu1 %891 }
 0x2b3   : > { %965 = vrot.lane.b32.xlu0 %v2284_v13, %s1865_s28  ;;  %v2368_v49 = vsel %vm253_vm9, %v892_v8, %v894_v39 }
 0x2b6   : > { %v890_v52 = vpop.permute.xlu1 %889 }
 0x2b7   : > { %925 = vrot.lane.b32.xlu0 %v2284_v13, %s1866_s29  ;;  %v2375_v53 = vsel %vm253_vm9, %v890_v52, %v892_v8 }
 0x2ba   : > { %v2387_v56 = vpop.permute.xlu1 %1171 }
 0x2bb   : > { %885 = vrot.lane.b32.xlu0 %v2284_v13, %s1867_s8 }
 0x2bf   : > { %1173 = vrot.lane.b32.xlu0 %v2151_v9, %s1868_s9 }
 0x2c3   : > { %1165 = vrot.lane.b32.xlu0 %v2284_v13, %s1868_s9 }
 0x2c7   : > { %1163 = vrot.lane.b32.xlu0 %v2288_v18, %s1868_s9 }
 0x2f9   : > { %v1124_v55 = vpop.permute.xlu0 %1123 }
 0x2fd   : > { %v1084_v57 = vpop.permute.xlu0 %1083 }
 0x300   : > { %v1128_v58 = vpop.permute.xlu1 %1127 }
 0x301   : > { %1147 = vst.msk [vmem:[#allocation2 + $0x160] sm:$0xff] %vm224_vm0, %v1128_v58  ;;  %v2390_v59 = vpop.permute.xlu0 %1043 }
 0x304   : > { %v1088_v60 = vpop.permute.xlu1 %1087 }
 0x305   : > { %1107 = vst.msk [vmem:[#allocation2 + $0x130] sm:$0xff] %vm224_vm0, %v1088_v60  ;;  %v2393_v61 = vpop.permute.xlu0 %1003 }
 0x308   : > { %v2395_v9 = vpop.permute.xlu1 %1047  ;;  %v1237_v62 = vld [vmem:[#allocation2 + $0x160] sm:$0xff] }
 0x309   : > { %1067 = vst.msk [vmem:[#allocation2 + $0x100] sm:$0xff] %vm224_vm0, %v2395_v9  ;;  %1324 = vmatpush1.msra.mxu1 %v1237_v62  ;;  %v2399_v63 = vpop.permute.xlu0 %963 }
 0x30a   : > { %1325 = vmatprep.subr.mxu1 %v1860_v0 }
 0x30b   : > { %1326 = vmatpush1.msra.mxu1 %v1234_v3 }
 0x30c   : > { %1327 = vmatprep.subr.mxu1 %v1860_v0  ;;  %v2403_v7 = vpop.permute.xlu1 %1007  ;;  %v1231_v10 = vld [vmem:[#allocation2 + $0x130] sm:$0xff] }
 0x30d   : > { %1027 = vst.msk [vmem:[#allocation2 + $0xd0] sm:$0xff] %vm224_vm0, %v2403_v7  ;;  %1328 = vmatpush1.msra.mxu1 %v1231_v10  ;;  %v2407_v11 = vpop.permute.xlu0 %923 }
 0x30e   : > { %1329 = vmatprep.subr.mxu1 %v1860_v0 }
 0x30f   : > { %1330 = vmatpush1.msra.mxu1 %v1228_v12 }
 0x310   : > { %1331 = vmatprep.subr.mxu1 %v1860_v0  ;;  %v2411_v14 = vpop.permute.xlu1 %967  ;;  %v1225_v15 = vld [vmem:[#allocation2 + $0x100] sm:$0xff] }
 0x311   : > { %987 = vst.msk [vmem:[#allocation2 + $0xa0] sm:$0xff] %vm224_vm0, %v2411_v14  ;;  %1332 = vmatpush1.msra.mxu1 %v1225_v15  ;;  %v2415_v16 = vpop.permute.xlu0 %883 }
 0x312   : > { %1333 = vmatprep.subr.mxu1 %v1860_v0 }
 0x313   : > { %1334 = vmatpush1.msra.mxu1 %v1222_v17 }
 0x314   : > { %1335 = vmatprep.subr.mxu1 %v1860_v0  ;;  %v2419_v19 = vpop.permute.xlu1 %927  ;;  %v1219_v20 = vld [vmem:[#allocation2 + $0xd0] sm:$0xff] }
 0x315   : > { %947 = vst.msk [vmem:[#allocation2 + $0x70] sm:$0xff] %vm224_vm0, %v2419_v19  ;;  %1336 = vmatpush1.msra.mxu1 %v1219_v20  ;;  %v1126_v6 = vpop.permute.xlu0 %1125 }
 0x316   : > { %1337 = vmatprep.subr.mxu1 %v1860_v0  ;;  %v1135_v5 = vsel %vm499_vm3, %v1124_v55, %v1126_v6  ;;  %v1136_v21 = vsel %vm499_vm3, %v1126_v6, %v1128_v58  ;;  %v1191_v55 = vld [vmem:[#allocation9] sm:$0xff]  ;;  %v781_v58 = vpop.f32.mrf.mxu1 }
 0x317   : > { %1338 = vmatpush1.msra.mxu1 %v1216_v22  ;;  %1252 = vmatprep.subr.mxu0 %v1136_v21 }
 0x318   : > { %1339 = vmatprep.subr.mxu1 %v1860_v0  ;;  %v2427_v24 = vpop.permute.xlu1 %887  ;;  %v1213_v25 = vld [vmem:[#allocation2 + $0xa0] sm:$0xff]  ;;  %1253 = vmatpush1.msra.mxu0 %v1135_v5 }
 0x319   : > { %907 = vst.msk [vmem:[#allocation2 + $0x40] sm:$0xff] %vm224_vm0, %v2427_v24  ;;  %1340 = vmatpush1.msra.mxu1 %v1213_v25  ;;  %v1086_v26 = vpop.permute.xlu0 %1085  ;;  %1254 = vmatprep.subr.mxu0 %v2298_v23 }
 0x31a   : > { %1341 = vmatprep.subr.mxu1 %v1860_v0  ;;  %v1095_v27 = vsel %vm458_vm4, %v1084_v57, %v1086_v26  ;;  %v1096_v29 = vsel %vm458_vm4, %v1086_v26, %v1088_v60  ;;  %1255 = vmatpush1.msra.mxu0 %v2306_v28  ;;  %v1578_v60 = vmul.f32 -1.442695, %v781_v58 }
 0x31b   : > { %1342 = vmatpush1.msra.mxu1 %v1210_v30  ;;  %1256 = vmatprep.subr.mxu0 %v1096_v29 }
 0x31c   : > { %1343 = vmatprep.subr.mxu1 %v1860_v0  ;;  %v1170_v32 = vpop.permute.xlu1 %1169  ;;  %v1207_v33 = vld [vmem:[#allocation2 + $0x70] sm:$0xff]  ;;  %1257 = vmatpush1.msra.mxu0 %v1095_v27 }
 0x31d   : > { %v2439_v35 = vsel %vm540_vm10, %v1170_v32, %v2387_v56  ;;  %1344 = vmatpush1.msra.mxu1 %v1207_v33  ;;  %v1046_v23 = vpop.permute.xlu0 %1045  ;;  %1258 = vmatprep.subr.mxu0 %v2314_v31  ;;  %v1198_v31 = vld [vmem:[#allocation2 + $0x28] sm:$0xff] }
 0x31e   : > { %1345 = vmatprep.subr.mxu1 %v2442_v36  ;;  %v1055_v28 = vsel %vm417_vm5, %v2390_v59, %v1046_v23  ;;  %v1056_v0 = vsel %vm417_vm5, %v1046_v23, %v2395_v9  ;;  %1259 = vmatpush1.msra.mxu0 %v2321_v34  ;;  %v783_v9 = vpop.f32.mrf.mxu1 }
 0x31f   : > { %1346 = vmatpush1.msra.mxu1 %v1204_v38  ;;  %1260 = vmatprep.subr.mxu0 %v1056_v0 }
 0x320   : > { %1347 = vmatprep.subr.mxu1 %v2442_v36  ;;  %v1168_v39 = vpop.permute.xlu1 %1167  ;;  %v1201_v41 = vld [vmem:[#allocation2 + $0x40] sm:$0xff]  ;;  %1261 = vmatpush1.msra.mxu0 %v1055_v28  ;;  %v786_v12 = vpop.f32.mrf.mxu1 }
 0x321   : > { %1187 = vst.msk [vmem:[#allocation2 + $0x190] sm:$0xff] %vm224_vm0, %v1168_v39  ;;  %1348 = vmatpush1.msra.mxu1 %v1201_v41  ;;  %v1006_v42 = vpop.permute.xlu0 %1005  ;;  %1262 = vmatprep.subr.mxu0 %v2328_v37  ;;  %v1701_v41 = vld [vmem:[%s2022_s6] sm:$0xff] }
 0x322   : > { %1349 = vmatprep.subr.mxu1 %v2442_v36  ;;  %v1015_v43 = vsel %vm376_vm6, %v2393_v61, %v1006_v42  ;;  %v1016_v34 = vsel %vm376_vm6, %v1006_v42, %v2403_v7  ;;  %1263 = vmatpush1.msra.mxu0 %v2335_v40 }
 0x323   : > { %1350 = vmatpush1.msra.mxu1 %v1198_v31  ;;  %1264 = vmatprep.subr.mxu0 %v1016_v34 }
 0x324   : > { %1351 = vmatprep.subr.mxu1 %v2442_v36  ;;  %1265 = vmatpush1.msra.mxu0 %v1015_v43 }
 0x325   : > { %1352 = vmatpush1.msra.mxu1 %v1195_v2  ;;  %v966_v45 = vpop.permute.xlu0 %965  ;;  %1266 = vmatprep.subr.mxu0 %v2344_v1 }
 0x326   : > { %v975_v37 = vsel %vm335_vm7, %v2399_v63, %v966_v45  ;;  %v976_v47 = vsel %vm335_vm7, %v966_v45, %v2411_v14  ;;  %1267 = vmatpush1.msra.mxu0 %v2350_v44  ;;  %1381 = vmatprep.subr.mxu1 %v2442_v36  ;;  %v788_v14 = vpop.f32.mrf.mxu1  ;;  %v1702_v45 = vld [vmem:[%s2022_s6 + $0x8] sm:$0xff]  ;;  %s1783_s6 = scalar_lea.vmem %s2514_s25, 384 }
 0x327   : > { %1268 = vmatprep.subr.mxu0 %v976_v47  ;;  %p1784_p11 = scmp.ne.s32.totalorder %s2514_s25, %s1783_s6  ;;  %p1791_p12 = scmp.lt.s32.totalorder %s1789_s23, %s1783_s6 }
 0x328   : > { %1269 = vmatpush1.msra.mxu0 %v975_v37  ;;  %v1243_v57 = vld [vmem:[#allocation2 + $0x190] sm:$0xff] }
 0x329   : > { %v926_v40 = vpop.permute.xlu0 %925  ;;  %1270 = vmatprep.subr.mxu0 %v2357_v46  ;;  %p1785_p1 = pnand %p1784_p11, %p2576_p10  ;;  %p1792_p7 = por %p1791_p12, %p1790_p6 }
 0x32a   : > { %v935_v8 = vsel %vm294_vm8, %v2407_v11, %v926_v40  ;;  %v936_v1 = vsel %vm294_vm8, %v926_v40, %v2419_v19  ;;  %1271 = vmatpush1.msra.mxu0 %v2363_v48 }
 0x32b   : > { %1272 = vmatprep.subr.mxu0 %v936_v1  ;;  %p1786_p2 = pneg %p1785_p1 }
 0x32c   : > { %1273 = vmatpush1.msra.mxu0 %v935_v8 }
 0x32d   : > { %v886_v50 = vpop.permute.xlu0 %885  ;;  %1274 = vmatprep.subr.mxu0 %v2368_v49  ;;  %p1793_p9 = pnand %p1792_p7, %p1786_p2 }
 0x32e   : > { %v895_v44 = vsel %vm253_vm9, %v2415_v16, %v886_v50  ;;  %v896_v51 = vsel %vm253_vm9, %v886_v50, %v2427_v24  ;;  %1275 = vmatpush1.msra.mxu0 %v2375_v53 }
 0x32f   : > { %1276 = vmatprep.subr.mxu0 %v896_v51 }
 0x330   : > { %1277 = vmatpush1.msra.mxu0 %v895_v44 }
 0x331   : > { %v1174_v46 = vpop.permute.xlu0 %1173  ;;  %1278 = vmatprep.subr.mxu0 %v2442_v36 }
 0x332   : > { %v1178_v48 = vsel %vm540_vm10, %v2387_v56, %v1174_v46  ;;  %1190 = vst.msk [vmem:[#allocation2 + $0x1a8] sm:$0xff] %vm224_vm0, %v1174_v46  ;;  %1279 = vmatpush1.msra.mxu0 %v2442_v36 }
 0x333   : > { %1280 = vmatprep.subr.mxu0 %v2284_v13  ;;  %v699_v13 = vpop.f32.mrf.mxu0 }
 0x334   : > { %1281 = vmatpush1.msra.mxu0 %v2288_v18  ;;  %v1576_v18 = vmul.f32 -1.442695, %v699_v13 }
 0x335   : > { %v1166_v49 = vpop.permute.xlu0 %1165  ;;  %1310 = vmatprep.subr.mxu0 %v1178_v48  ;;  %v701_v59 = vpop.f32.mrf.mxu0 }
 0x336   : > { %v1176_v52 = vsel %vm540_vm10, %v1166_v49, %v1168_v39  ;;  %1311 = vmatpush2.msra.mxu0 %v2439_v35  ;;  %1682 = vpow2.f32 %v1576_v18  ;;  %v1577_v61 = vmul.f32 -1.442695, %v701_v59 }
 0x337   : > { %1312 = vmatprep.subr.mxu0 %v1176_v52  ;;  %1684 = vpow2.f32 %v1578_v60  ;;  %v705_v5 = vpop.f32.mrf.mxu0 }
 0x338   : > { %1686 = vpow2.f32 %v1577_v61 }
 0x339   : > { %v1164_v53 = vpop.permute.xlu0 %1163  ;;  %v1246_v54 = vld [vmem:[#allocation2 + $0x1a8] sm:$0xff]  ;;  %v707_v21 = vpop.f32.mrf.mxu0 }
 0x33a   : > { %v1175_v56 = vsel %vm540_vm10, %v1164_v53, %v1166_v49  ;;  %1382 = vmatpush2.msra.mxu1 %v1246_v54 }
 0x33b   : > { %1383 = vmatprep.subr.mxu1 %v2442_v36  ;;  %1313 = vmatpush2.msra.mxu0 %v1175_v56 }
 0x33c   : > { %1384 = vmatpush2.msra.mxu1 %v1243_v57  ;;  %1315 = vmatmul.mubr.f32.vlgmr.msra.gmra.mxu0 %v1191_v55 }
 0x33d   : > { %1386 = vmatmul.mubr.f32.vlgmr.msra.gmra.mxu1 %v1191_v55 }
 0x343   : > { %v1683_v62 = vpop.eup %1682 }
 0x344   : > { %v1685_v63 = vpop.eup %1684  ;;  %v817_v3 = vadd.f32 1.0, %v1683_v62 }
 0x345   : > { %v1687_v7 = vpop.eup %1686  ;;  %v819_v10 = vadd.f32 1.0, %v1685_v63 }
 0x346   : > { %1688 = vrcp.f32 %v817_v3  ;;  %v818_v11 = vadd.f32 1.0, %v1687_v7 }
 0x347   : > { %1690 = vrcp.f32 %v819_v10 }
 0x348   : > { %1692 = vrcp.f32 %v818_v11 }
 0x353   : > { %v1689_v15 = vpop.eup %1688 }
 0x354   : > { %v1691_v16 = vpop.eup %1690  ;;  %v1397_v17 = vsub.f32 1.0, %v1689_v15 }
 0x355   : > { %v1693_v19 = vpop.eup %1692  ;;  %v1399_v20 = vsub.f32 1.0, %v1691_v16 }
 0x356   : > { %1403 = vrot.lane.b32.xlu1 %v1397_v17, %s1869_s17  ;;  %v1398_v6 = vsub.f32 1.0, %v1693_v19 }
 0x358   : > { %1405 = vrot.lane.b32.xlu0 %v1398_v6, %s1869_s17 }
 0x35a   : > { %1407 = vrot.lane.b32.xlu1 %v1399_v20, %s1869_s17 }
 0x3c8   : > { %v1404_v0 = vpop.permute.xlu1 %1403 }
 0x3c9   : > { %v1414_v31 = vmul.f32 %v1701_v41, %v1404_v0 }
 0x3ca   : > { %v1406_v38 = vpop.permute.xlu0 %1405 }
 0x3cb   : > { %v1409_v42 = vsel %vm845_vm12, %v1404_v0, %v1406_v38 }
 0x3cc   : > { %v1408_v39 = vpop.permute.xlu1 %1407  ;;  %v1415_v37 = vmul.f32 %v1702_v45, %v1409_v42 }
 0x3cd   : > { %v1410_v34 = vsel %vm845_vm12, %v1406_v38, %v1408_v39 }
 0x3ce   : > { %v1416_v8 = vmul.f32 %v1410_v34, %v2049_v4 }
 0x3fc   : > { %v1316_v22 = vpop.f32.mrf.mxu0 }
 0x3fd   : > { %v1391_v24 = vadd.f32 %v1316_v22, %v705_v5  ;;  %v1387_v25 = vpop.f32.mrf.mxu1 }
 0x3fe   : > { %v1393_v26 = vadd.f32 %v1387_v25, %v786_v12  ;;  %v1318_v27 = vpop.f32.mrf.mxu0 }
 0x3ff   : > { %1694 = vtanh.f32 %v1391_v24  ;;  %v1392_v29 = vadd.f32 %v1318_v27, %v707_v21  ;;  %v1389_v30 = vpop.f32.mrf.mxu1 }
 0x400   : > { %1696 = vtanh.f32 %v1393_v26 }
 0x401   : > { %1698 = vtanh.f32 %v1392_v29 }
 0x40c   : > { %v1695_v32 = vpop.eup %1694 }
 0x40d   : > { %v1697_v33 = vpop.eup %1696  ;;  %v1417_v35 = vmul.f32 %v1695_v32, %v1689_v15 }
 0x40e   : > { %v1699_v23 = vpop.eup %1698  ;;  %v1419_v28 = vmul.f32 %v1697_v33, %v1691_v16 }
 0x40f   : > { %1423 = vrot.lane.b32.xlu0 %v1417_v35, %s1869_s17  ;;  %v1418_v36 = vmul.f32 %v1699_v23, %v1693_v19 }
 0x411   : > { %1425 = vrot.lane.b32.xlu1 %v1418_v36, %s1869_s17 }
 0x413   : > { %1427 = vrot.lane.b32.xlu0 %v1419_v28, %s1869_s17 }
 0x481   : > { %v1424_v43 = vpop.permute.xlu0 %1423 }
 0x482   : > { %v1434_v2 = vadd.f32 %v1424_v43, %v1414_v31 }
 0x483   : > { %v1426_v47 = vpop.permute.xlu1 %1425 }
 0x484   : > { %v1429_v40 = vsel %vm845_vm12, %v1424_v43, %v1426_v47  ;;  %1440 = vrot.lane.b32.xlu1 %v1434_v2, %s1864_s26 }
 0x485   : > { %v1435_v1 = vadd.f32 %v1429_v40, %v1415_v37  ;;  %v1428_v50 = vpop.permute.xlu0 %1427 }
 0x486   : > { %v1430_v44 = vsel %vm845_vm12, %v1426_v47, %v1428_v50 }
 0x487   : > { %v1436_v51 = vadd.f32 %v1430_v44, %v1416_v8  ;;  %1442 = vrot.lane.b32.xlu0 %v1435_v1, %s1864_s26 }
 0x489   : > { %1444 = vrot.lane.b32.xlu1 %v1436_v51, %s1864_s26 }
 0x4f6   : > { %v1441_v46 = vpop.permute.xlu1 %1440 }
 0x4f9   : > { %v1443_v48 = vpop.permute.xlu0 %1442 }
 0x4fa   : > { %v1446_v49 = vsel %vm376_vm6, %v1441_v46, %v1443_v48 }
 0x4fb   : > { %1451 = vst [vmem:[%s215_s24] sm:$0xff] %v1446_v49  ;;  %v1445_v4 = vpop.permute.xlu1 %1444 }
 0x4fc   : > { %v1447_v52 = vsel %vm376_vm6, %v1443_v48, %v1445_v4  ;;  %1453 = vst.msk [vmem:[%s215_s24 + $0x10] sm:$0xff] %vm224_vm0, %v1445_v4 }
 0x4fd   : > { %1452 = vst [vmem:[%s215_s24 + $0x8] sm:$0xff] %v1447_v52 }
 0x4fe   : > { %1796 = shalt.err (!%p1793_p9)
}
 0x4ff   : > { %s1797_s26 = scalar_lea.hbm %s2512_s5, 384  ;;  %s1801_s29 = scalar_lea.hbm %s2560_s3, 768 }
 0x500   : > { %p1798_p13 = scmp.ne.s32.totalorder %s2512_s5, %s1797_s26  ;;  %p1802_p4 = scmp.lt.s32.totalorder %s2512_s5, %s2560_s3 }
 0x501   : > { %p1803_p8 = scmp.lt.s32.totalorder %s1801_s29, %s1797_s26 }
 0x502   : > { %p1799_p5 = pnand %p1798_p13, %p2576_p10 }
 0x503   : > { %p1804_p3 = por %p1803_p8, %p1802_p4 }
 0x504   : > { %p1800_p0 = pneg %p1799_p5 }
 0x506   : > { %p1805_p11 = pnand %p1804_p3, %p1800_p0 }
 0x508   : > { %1808 = shalt.err (!%p1805_p11)
}
 0x509   : > { %1599 = dma.vmem_to_hbm [thread:$0]  (%p2576_p10), %s2514_s25, 384, %s2512_s5, %s1455_s16  }
 0x50a PF: > { %s1481_s17 = sand.u32 1, %s1839_s12   ;;  %p2577_p1 = scmp.ne.s32.totalorder %s2566_s19, 0 }
 0x50b   : > { %p2578_p2 = scmp.ge.s32.totalorder %s1851_s15, 2  ;;  %s1482_s21 = scalar_lea.sflag [#allocation6], %s1481_s17 }
 0x50d   : > { %p1613_p6 = pnand %p2578_p2, %p2577_p1 }
 0x50f   : > { %p1614_p12 = pneg %p1613_p6 }
 0x511   : > { %1834 = dma.done.wait (%p1614_p12), %s1482_s21, 384  }
 0x512   : > { %1836 = vsyncadd (%p1614_p12), %s1482_s21, 4294966912  ;;  %p17_p7 = scmp.ge.s32.totalorder %s1963_s7, 4   ;;  %s2579_s12 = smov %s1843_s13 }
 0x513   : > { %s2580_s13 = smov %s1847_s14  ;;  %s2581_s14 = smov %s1979_s11 }
 0x514   : > { %s2582_s15 = smov %s1963_s7  ;;  %19 = sbr.rel (!%p17_p7) target bundleno = 6 (0x6), region = 85 }
 0x519   :  { %1487 = vsyncpa [#allocation5], 1 }
 0x51a   :  { %1489 = vsyncpa [#allocation5 + $0x1], 1 }
 0x51b   :  { %1490 = vsyncpa [#allocation8], 1 }
 0x51c   :  { %1491 = vsyncpa [#allocation6], 1 }
 0x51d   :  { %1493 = vsyncpa [#allocation6 + $0x1], 1 }

</bundles_post_ra>
